<compile_context>
chip_gen: v6e
topology: v6e:2x2x1
jax: 0.10.0
libtpu: 0.0.40
codegen_flags: <defaults>
</compile_context>

<pallas_src>
from functools import partial

import jax
import jax.numpy as jnp
from jax.experimental import pallas as pl
from jax.experimental.pallas import tpu as pltpu

INPUT_DIM = 13            # load_wine() feature count
OUTPUT_DIM = 3            # load_wine() class count
DIMS = (INPUT_DIM, 64, 32, 32, 16, OUTPUT_DIM)
NUM_LAYERS = len(DIMS) - 1
NPAD = 128                # lane-dense padded width for every layer
ONE_LANE = NPAD - 1       # reserved lane carrying a constant 1.0 (bias fold)


def mlp_kernel(x_ref, w_ref, o_ref, *, precision):
    """Full 5-layer MLP forward on one (TB, 128) activation tile.

    All layer widths are zero-padded to 128 lanes.  Row ONE_LANE of each
    (128, 128) weight slab holds that layer's bias and W[ONE_LANE, ONE_LANE]=1,
    so lane ONE_LANE of the activations stays exactly 1.0 through every ReLU
    and the bias add rides the matmul for free.  Padded lanes stay exactly 0.
    """
    cdt = x_ref.dtype
    h = x_ref[...]
    for layer in range(NUM_LAYERS - 1):
        y = jnp.dot(h, w_ref[layer], preferred_element_type=jnp.float32,
                    precision=precision)
        h = jnp.maximum(y, 0.0).astype(cdt)
    out = jnp.dot(h, w_ref[NUM_LAYERS - 1],
                  preferred_element_type=jnp.float32, precision=precision)
    o_ref[...] = out.astype(o_ref.dtype)


def _round_up(n, m):
    return ((n + m - 1) // m) * m


def _choose_tile(batch, block_batch):
    """Batch tile: multiple of 16 rows; for big batches, make the block count
    >=2 and even so the two v7x TensorCores split the grid evenly."""
    rounded = _round_up(batch, 16)
    if rounded <= block_batch:
        return rounded                      # single block (small batch)
    nb = pl.cdiv(rounded, block_batch)
    if nb % 2:
        nb += 1                             # even block count for 2 TCs
    return _round_up(pl.cdiv(rounded, nb), 16)


def pack_params(params, compute_dtype):
    """Stack the 5 (W[in,out], b[out]) pairs into one zero-padded [5,128,128] slab."""
    wstack = jnp.zeros((NUM_LAYERS, NPAD, NPAD), jnp.float32)
    for i, (w, b) in enumerate(params):
        din, dout = w.shape
        # Lane ONE_LANE is reserved for the constant-1 bias trick.
        assert din <= ONE_LANE and dout <= ONE_LANE, (
            f"layer {i}: width ({din},{dout}) would clobber the ones lane")
        wstack = wstack.at[i, :din, :dout].set(w)
        wstack = wstack.at[i, ONE_LANE, :dout].set(b)       # folded bias row
        wstack = wstack.at[i, ONE_LANE, ONE_LANE].set(1.0)  # propagate ones lane
    return wstack.astype(compute_dtype)


def _mlp_forward_impl(x, params, *, compute_dtype, block_batch):
    """x: [B, INPUT_DIM] f32.  params: list of (W[in, out] f32, b[out] f32)."""
    batch = x.shape[0]
    tb = _choose_tile(batch, block_batch)
    num_blocks = pl.cdiv(batch, tb)
    b_pad = num_blocks * tb

    # Lane-dense padded input built directly in compute_dtype (fuses under jit;
    # no f32 padded intermediate hits HBM).  NOTE: the ones lane is also set on
    # padding rows past `batch`; those rows produce bias-only garbage and are
    # discarded by the [:batch] slice below -- do not reuse the padded output.
    xp = jnp.zeros((b_pad, NPAD), compute_dtype)
    xp = xp.at[:batch, :INPUT_DIM].set(x.astype(compute_dtype))
    xp = xp.at[:, ONE_LANE].set(1.0)

    wstack = pack_params(params, compute_dtype)

    precision = (jax.lax.Precision.HIGHEST if compute_dtype == jnp.float32
                 else jax.lax.Precision.DEFAULT)

    out = pl.pallas_call(
        partial(mlp_kernel, precision=precision),
        # Output in compute_dtype: halves writeback bytes vs the old f32 slab.
        out_shape=jax.ShapeDtypeStruct((b_pad, NPAD), compute_dtype),
        grid=(num_blocks,),
        in_specs=[
            # activations: streamed / double-buffered over the batch grid
            pl.BlockSpec((tb, NPAD), lambda i: (i, 0)),
            # weights: untiled, single-buffered, resident in VMEM for all steps
            pl.BlockSpec(memory_space=pltpu.MemorySpace.VMEM),
        ],
        out_specs=pl.BlockSpec((tb, NPAD), lambda i: (i, 0)),
        compiler_params=pltpu.CompilerParams(
            dimension_semantics=("parallel",)),  # v7x: 2 TCs split batch tiles
        # Default scoped VMEM is ample here (bf16 out, TB<=2048 => < 4 MiB),
        # so no vmem_limit_bytes override is needed even on v5e.
    )(xp, wstack)

    return out[:batch, :OUTPUT_DIM].astype(jnp.float32)


mlp_forward = jax.jit(_mlp_forward_impl,
                      static_argnames=("compute_dtype", "block_batch"))


def init_params(key):
    """PyTorch-default nn.Linear init; W stored [in, out] (pre-transposed)."""
    params = []
    for i in range(NUM_LAYERS):
        key, kw, kb = jax.random.split(key, 3)
        fan_in = DIMS[i]
        bound = 1.0 / jnp.sqrt(fan_in)
        w = jax.random.uniform(kw, (DIMS[i], DIMS[i + 1]), jnp.float32,
                               minval=-bound, maxval=bound)
        b = jax.random.uniform(kb, (DIMS[i + 1],), jnp.float32,
                               minval=-bound, maxval=bound)
        params.append((w, b))
    return params


def reference_forward(x, params):
    h = x
    for i, (w, b) in enumerate(params):
        h = jnp.dot(h, w, precision=jax.lax.Precision.HIGHEST) + b
        if i < len(params) - 1:
            h = jnp.maximum(h, 0.0)
    return h


if __name__ == "__main__":
    key = jax.random.PRNGKey(0)
    key, kx = jax.random.split(key)
    batch = 32
    x = jax.random.normal(kx, (batch, INPUT_DIM), dtype=jnp.float32)
    params = init_params(key)

    ref = reference_forward(x, params)

    # f32-compute path (Precision.HIGHEST): should match the reference tightly.
    out_f32 = jax.block_until_ready(
        mlp_forward(x, params, compute_dtype=jnp.float32, block_batch=2048))
    assert out_f32.shape == (batch, OUTPUT_DIM)
    assert jnp.allclose(out_f32, ref, atol=1e-4, rtol=1e-4)

    # bf16-compute path (MXU-friendly default): loose tolerance.
    out_bf16 = jax.block_until_ready(
        mlp_forward(x, params, compute_dtype=jnp.bfloat16, block_batch=2048))
    assert out_bf16.shape == (batch, OUTPUT_DIM)
    assert jnp.allclose(out_bf16, ref, atol=1e-1, rtol=1e-1)

    print("KERNEL_OK")
</pallas_src>

<mosaic_0001>
module attributes {stable_mosaic.version = 11 : i64} {
  func.func @mlp_kernel(%arg0: i32, %arg1: memref<32x128xf32, #tpu.memory_space<vmem>>, %arg2: memref<5x128x128xf32, #tpu.memory_space<vmem>>, %arg3: memref<32x128xf32, #tpu.memory_space<vmem>>) attributes {dimension_semantics = [#tpu.dimension_semantics<parallel>], iteration_bounds = array<i64: 1>, scalar_prefetch = 0 : i64, scratch_operands = 0 : i64, tpu.core_type = #tpu.core_type<tc>, window_params = [{transform_indices = @transform_0, window_bounds = array<i64: 32, 128>}, {pipeline_mode = #tpu.pipeline_mode<synchronous>, transform_indices = @transform_1, window_bounds = array<i64: 5, 128, 128>}, {transform_indices = @transform_2, window_bounds = array<i64: 32, 128>}]} {
    %c0 = arith.constant 0 : index
    %c0_0 = arith.constant 0 : index
    %0 = vector.load %arg1[%c0, %c0_0] : memref<32x128xf32, #tpu.memory_space<vmem>>, vector<32x128xf32>
    %c0_1 = arith.constant 0 : index
    %c0_2 = arith.constant 0 : index
    %c0_3 = arith.constant 0 : index
    %1 = vector.load %arg2[%c0_1, %c0_2, %c0_3] : memref<5x128x128xf32, #tpu.memory_space<vmem>>, vector<1x128x128xf32>
    %2 = vector.shape_cast %1 : vector<1x128x128xf32> to vector<128x128xf32>
    %cst = arith.constant dense<0.000000e+00> : vector<32x128xf32>
    %3 = tpu.matmul %0, %2, %cst {dimension_numbers = #tpu.dot_dimension_numbers<[1], [0], [0], [1], [0, 0, 1, 1], [], []>, precision = #tpu.contract_precision<fp32>} : vector<32x128xf32>, vector<128x128xf32>, vector<32x128xf32> -> vector<32x128xf32>
    %cst_4 = arith.constant 0.000000e+00 : f32
    %4 = vector.broadcast %cst_4 : f32 to vector<32x128xf32>
    %5 = arith.maximumf %3, %4 : vector<32x128xf32>
    %c1 = arith.constant 1 : index
    %c0_5 = arith.constant 0 : index
    %c0_6 = arith.constant 0 : index
    %6 = vector.load %arg2[%c1, %c0_5, %c0_6] : memref<5x128x128xf32, #tpu.memory_space<vmem>>, vector<1x128x128xf32>
    %7 = vector.shape_cast %6 : vector<1x128x128xf32> to vector<128x128xf32>
    %cst_7 = arith.constant dense<0.000000e+00> : vector<32x128xf32>
    %8 = tpu.matmul %5, %7, %cst_7 {dimension_numbers = #tpu.dot_dimension_numbers<[1], [0], [0], [1], [0, 0, 1, 1], [], []>, precision = #tpu.contract_precision<fp32>} : vector<32x128xf32>, vector<128x128xf32>, vector<32x128xf32> -> vector<32x128xf32>
    %cst_8 = arith.constant 0.000000e+00 : f32
    %9 = vector.broadcast %cst_8 : f32 to vector<32x128xf32>
    %10 = arith.maximumf %8, %9 : vector<32x128xf32>
    %c2 = arith.constant 2 : index
    %c0_9 = arith.constant 0 : index
    %c0_10 = arith.constant 0 : index
    %11 = vector.load %arg2[%c2, %c0_9, %c0_10] : memref<5x128x128xf32, #tpu.memory_space<vmem>>, vector<1x128x128xf32>
    %12 = vector.shape_cast %11 : vector<1x128x128xf32> to vector<128x128xf32>
    %cst_11 = arith.constant dense<0.000000e+00> : vector<32x128xf32>
    %13 = tpu.matmul %10, %12, %cst_11 {dimension_numbers = #tpu.dot_dimension_numbers<[1], [0], [0], [1], [0, 0, 1, 1], [], []>, precision = #tpu.contract_precision<fp32>} : vector<32x128xf32>, vector<128x128xf32>, vector<32x128xf32> -> vector<32x128xf32>
    %cst_12 = arith.constant 0.000000e+00 : f32
    %14 = vector.broadcast %cst_12 : f32 to vector<32x128xf32>
    %15 = arith.maximumf %13, %14 : vector<32x128xf32>
    %c3 = arith.constant 3 : index
    %c0_13 = arith.constant 0 : index
    %c0_14 = arith.constant 0 : index
    %16 = vector.load %arg2[%c3, %c0_13, %c0_14] : memref<5x128x128xf32, #tpu.memory_space<vmem>>, vector<1x128x128xf32>
    %17 = vector.shape_cast %16 : vector<1x128x128xf32> to vector<128x128xf32>
    %cst_15 = arith.constant dense<0.000000e+00> : vector<32x128xf32>
    %18 = tpu.matmul %15, %17, %cst_15 {dimension_numbers = #tpu.dot_dimension_numbers<[1], [0], [0], [1], [0, 0, 1, 1], [], []>, precision = #tpu.contract_precision<fp32>} : vector<32x128xf32>, vector<128x128xf32>, vector<32x128xf32> -> vector<32x128xf32>
    %cst_16 = arith.constant 0.000000e+00 : f32
    %19 = vector.broadcast %cst_16 : f32 to vector<32x128xf32>
    %20 = arith.maximumf %18, %19 : vector<32x128xf32>
    %c4 = arith.constant 4 : index
    %c0_17 = arith.constant 0 : index
    %c0_18 = arith.constant 0 : index
    %21 = vector.load %arg2[%c4, %c0_17, %c0_18] : memref<5x128x128xf32, #tpu.memory_space<vmem>>, vector<1x128x128xf32>
    %22 = vector.shape_cast %21 : vector<1x128x128xf32> to vector<128x128xf32>
    %cst_19 = arith.constant dense<0.000000e+00> : vector<32x128xf32>
    %23 = tpu.matmul %20, %22, %cst_19 {dimension_numbers = #tpu.dot_dimension_numbers<[1], [0], [0], [1], [0, 0, 1, 1], [], []>, precision = #tpu.contract_precision<fp32>} : vector<32x128xf32>, vector<128x128xf32>, vector<32x128xf32> -> vector<32x128xf32>
    %c0_20 = arith.constant 0 : index
    %c0_21 = arith.constant 0 : index
    %24 = vector.load %arg3[%c0_20, %c0_21] : memref<32x128xf32, #tpu.memory_space<vmem>>, vector<32x128xf32>
    tpu.vector_store %arg3[%c0_20, %c0_21], %23 {strides = array<i32>} : memref<32x128xf32, #tpu.memory_space<vmem>>, vector<32x128xf32>,
    return
  }
  func.func @transform_0(%arg0: i32) -> (i32, i32) {
    %c0_i32 = arith.constant 0 : i32
    %c0_i32_0 = arith.constant 0 : i32
    return %arg0, %c0_i32 : i32, i32
  }
  func.func @transform_1(%arg0: i32) -> (i32, i32, i32) {
    %c0_i32 = arith.constant 0 : i32
    %c0_i32_0 = arith.constant 0 : i32
    %c0_i32_1 = arith.constant 0 : i32
    %c0_i32_2 = arith.constant 0 : i32
    return %c0_i32, %c0_i32_0, %c0_i32_1 : i32, i32, i32
  }
  func.func @transform_2(%arg0: i32) -> (i32, i32) {
    %c0_i32 = arith.constant 0 : i32
    %c0_i32_0 = arith.constant 0 : i32
    return %arg0, %c0_i32 : i32, i32
  }
}

</mosaic_0001>

<bundles_post_ra>
// kernel: _mlp_forward_impl.1
= control target key start
LH: loop header
LB: loop body
LE: loop exit
PB: predicated region body
PF: predicated region fallthrough
CT: control target
= control target key end

     0   :  { %s7920_s1 = inlined_call_operand.vmem [shape: f32[5,128,128], index: 1, kind: input, shape index: {}]   ;;  %s7921_s0 = inlined_call_operand.vmem [shape: f32[32,128], index: 0, kind: input, shape index: {}]   ;;  %s7922_s2 = inlined_call_operand.vmem [shape: f32[32,128], index: 2, kind: output, shape index: {}]  }
   0x1   :  { %v30_v0 = vld [vmem:[%s7920_s1 + $0x78] sm:$0xff]  ;;  %v29_v1 = vld [vmem:[%s7920_s1 + $0x70] sm:$0xff]  ;;  %v28_v2 = vld [vmem:[%s7920_s1 + $0x68] sm:$0xff] }
   0x2   :  { %v5801_v3 = vand.u32 4294901760, %v30_v0  ;;  %v5803_v4 = vand.u32 4294901760, %v29_v1  ;;  %v5805_v5 = vand.u32 4294901760, %v28_v2  ;;  %v27_v6 = vld [vmem:[%s7920_s1 + $0x60] sm:$0xff]  ;;  %v26_v7 = vld [vmem:[%s7920_s1 + $0x58] sm:$0xff]  ;;  %v25_v8 = vld [vmem:[%s7920_s1 + $0x50] sm:$0xff] }
   0x3   :  { %v5816_v9 = vand.u32 4294901760, %v27_v6  ;;  %v5818_v10 = vand.u32 4294901760, %v26_v7  ;;  %v5820_v11 = vand.u32 4294901760, %v25_v8  ;;  %v24_v12 = vld [vmem:[%s7920_s1 + $0x48] sm:$0xff]  ;;  %v23_v13 = vld [vmem:[%s7920_s1 + $0x40] sm:$0xff]  ;;  %v22_v18 = vld [vmem:[%s7920_s1 + $0x38] sm:$0xff] }
   0x4   :  { %4637 = vmatprep.subr.mxu0 %v5801_v3  ;;  %v5830_v14 = vsub.f32 %v30_v0, %v5801_v3  ;;  %v5833_v15 = vsub.f32 %v29_v1, %v5803_v4  ;;  %v5835_v16 = vand.u32 4294901760, %v24_v12  ;;  %v5838_v17 = vsub.f32 %v28_v2, %v5805_v5  ;;  %v21_v25 = vld [vmem:[%s7920_s1 + $0x30] sm:$0xff]  ;;  %v20_v35 = vld [vmem:[%s7920_s1 + $0x28] sm:$0xff]  ;;  %v19_v40 = vld [vmem:[%s7920_s1 + $0x20] sm:$0xff] }
   0x5   :  { %4638 = vmatpush3.msra.mxu0 %v5801_v3  ;;  %v5845_v19 = vsub.f32 %v27_v6, %v5816_v9  ;;  %v5848_v20 = vsub.f32 %v26_v7, %v5818_v10  ;;  %v5860_v24 = vand.u32 4294901760, %v23_v13  ;;  %v5869_v27 = vand.u32 4294901760, %v22_v18  ;;  %v18_v48 = vld [vmem:[%s7920_s1 + $0x18] sm:$0xff]  ;;  %v11_v49 = vld [vmem:[%s7921_s0] sm:$0xff]  ;;  %v12_v54 = vld [vmem:[%s7921_s0 + $0x8] sm:$0xff] }
   0x6   :  { %4639 = vmatprep.subr.mxu0 %v5803_v4  ;;  %v5852_v21 = vand.u32 4294901760, %v5830_v14  ;;  %v5855_v22 = vand.u32 4294901760, %v5833_v15  ;;  %v5858_v23 = vand.u32 4294901760, %v5838_v17  ;;  %v5875_v29 = vsub.f32 %v25_v8, %v5820_v11  ;;  %v17_v59 = vld [vmem:[%s7920_s1 + $0x10] sm:$0xff]  ;;  %v16_v2 = vld [vmem:[%s7920_s1 + $0x8] sm:$0xff] }
   0x7   :  { %4640 = vmatpush3.msra.mxu0 %v5803_v4  ;;  %v5867_v26 = vand.u32 4294901760, %v5845_v19  ;;  %v5872_v28 = vand.u32 4294901760, %v5848_v20  ;;  %v5885_v33 = vsub.f32 %v24_v12, %v5835_v16  ;;  %v5888_v34 = vand.u32 4294901760, %v21_v25 }
   0x8   :  { %4641 = vmatprep.subr.mxu0 %v5805_v5  ;;  %v156_v30 = vsub.f32 %v5830_v14, %v5852_v21  ;;  %v163_v31 = vsub.f32 %v5833_v15, %v5855_v22  ;;  %v170_v32 = vsub.f32 %v5838_v17, %v5858_v23  ;;  %v5897_v39 = vand.u32 4294901760, %v5875_v29 }
   0x9   :  { %4642 = vmatpush3.msra.mxu0 %v5805_v5  ;;  %v177_v38 = vsub.f32 %v5845_v19, %v5867_v26  ;;  %v184_v41 = vsub.f32 %v5848_v20, %v5872_v28  ;;  %v5906_v42 = vand.u32 4294901760, %v5885_v33  ;;  %v5909_v43 = vsub.f32 %v23_v13, %v5860_v24 }
   0xa   :  { %4643 = vmatprep.subr.mxu0 %v5816_v9  ;;  %v157_v36 = vand.u32 4294901760, %v156_v30  ;;  %v164_v37 = vand.u32 4294901760, %v163_v31  ;;  %v171_v44 = vand.u32 4294901760, %v170_v32  ;;  %v5912_v45 = vand.u32 4294901760, %v20_v35 }
   0xb   :  { %4644 = vmatpush3.msra.mxu0 %v5816_v9  ;;  %v5915_v46 = vsub.f32 %v22_v18, %v5869_v27  ;;  %v5918_v47 = vand.u32 4294901760, %v19_v40  ;;  %v178_v50 = vand.u32 4294901760, %v177_v38  ;;  %v191_v51 = vsub.f32 %v5875_v29, %v5897_v39  ;;  %v15_v18 = vld [vmem:[%s7920_s1] sm:$0xff] }
   0xc   :  { %4645 = vmatprep.subr.mxu0 %v5818_v10  ;;  %4675 = vmatprep.subr.mxu1 %v157_v36  ;;  %v5930_v52 = vand.u32 4294901760, %v5909_v43  ;;  %v5933_v53 = vsub.f32 %v21_v25, %v5888_v34  ;;  %v185_v55 = vand.u32 4294901760, %v184_v41  ;;  %v198_v56 = vsub.f32 %v5885_v33, %v5906_v42 }
   0xd   :  { %4646 = vmatpush3.msra.mxu0 %v5818_v10  ;;  %4676 = vmatpush3.msra.mxu1 %v157_v36  ;;  %v5942_v57 = vand.u32 4294901760, %v18_v48  ;;  %v5945_v58 = vand.u32 4294901760, %v5915_v46  ;;  %v5951_v60 = vsub.f32 %v20_v35, %v5912_v45  ;;  %v5953_v61 = vand.u32 4294901760, %v11_v49 }
   0xe   :  { %4647 = vmatprep.subr.mxu0 %v5820_v11  ;;  %4677 = vmatprep.subr.mxu1 %v164_v37  ;;  %v5956_v62 = vand.u32 4294901760, %v12_v54  ;;  %v192_v63 = vand.u32 4294901760, %v191_v51  ;;  %v205_v0 = vsub.f32 %v5909_v43, %v5930_v52  ;;  %v5962_v1 = vand.u32 4294901760, %v5933_v53 }
   0xf   :  { %4648 = vmatpush3.msra.mxu0 %v5820_v11  ;;  %4678 = vmatpush3.msra.mxu1 %v164_v37  ;;  %v5968_v6 = vsub.f32 %v19_v40, %v5918_v47  ;;  %v199_v7 = vand.u32 4294901760, %v198_v56  ;;  %v5971_v8 = vand.u32 4294901760, %v17_v59  ;;  %v212_v12 = vsub.f32 %v5915_v46, %v5945_v58 }
  0x10   :  { %4649 = vmatprep.subr.mxu0 %v5835_v16  ;;  %4679 = vmatprep.subr.mxu1 %v171_v44  ;;  %v5977_v13 = vand.u32 4294901760, %v5951_v60  ;;  %v5983_v25 = vsub.f32 %v11_v49, %v5953_v61  ;;  %v5986_v30 = vsub.f32 %v18_v48, %v5942_v57  ;;  %v5989_v31 = vand.u32 4294901760, %v16_v2 }
  0x11   :  { %4650 = vmatpush3.msra.mxu0 %v5835_v16  ;;  %4680 = vmatpush3.msra.mxu1 %v171_v44  ;;  %v5992_v32 = vsub.f32 %v12_v54, %v5956_v62  ;;  %v206_v35 = vand.u32 4294901760, %v205_v0  ;;  %v219_v36 = vsub.f32 %v5933_v53, %v5962_v1  ;;  %v5998_v37 = vand.u32 4294901760, %v5968_v6 }
  0x12   :  { %4651 = vmatprep.subr.mxu0 %v5860_v24  ;;  %4681 = vmatprep.subr.mxu1 %v178_v50  ;;  %v6001_v38 = vand.u32 4294901760, %v15_v18  ;;  %v6004_v40 = vsub.f32 %v17_v59, %v5971_v8  ;;  %v213_v41 = vand.u32 4294901760, %v212_v12  ;;  %v226_v44 = vsub.f32 %v5951_v60, %v5977_v13 }
  0x13   :  { %4652 = vmatpush3.msra.mxu0 %v5860_v24  ;;  %4682 = vmatpush3.msra.mxu1 %v178_v50  ;;  %v7924_v48 = vand.u32 4294901760, %v5983_v25  ;;  %v6011_v49 = vand.u32 4294901760, %v5986_v30  ;;  %v7923_v50 = vand.u32 4294901760, %v5992_v32  ;;  %v6016_v51 = vsub.f32 %v16_v2, %v5989_v31 }
  0x14   :  { %4653 = vmatprep.subr.mxu0 %v5869_v27  ;;  %4683 = vmatprep.subr.mxu1 %v185_v55  ;;  %v220_v54 = vand.u32 4294901760, %v219_v36  ;;  %v6023_v56 = vand.u32 4294901760, %v6004_v40  ;;  %v6026_v59 = vsub.f32 %v15_v18, %v6001_v38 }
  0x15   :  { %4654 = vmatpush3.msra.mxu0 %v5869_v27  ;;  %4684 = vmatpush3.msra.mxu1 %v185_v55  ;;  %v233_v55 = vsub.f32 %v5968_v6, %v5998_v37  ;;  %v115_v0 = vsub.f32 %v5983_v25, %v7924_v48  ;;  %v240_v2 = vsub.f32 %v5986_v30, %v6011_v49  ;;  %v6039_v12 = vand.u32 4294901760, %v6016_v51 }
  0x16   :  { %4655 = vmatprep.subr.mxu0 %v5888_v34  ;;  %4685 = vmatprep.subr.mxu1 %v192_v63  ;;  %v6046_v36 = vand.u32 4294901760, %v6026_v59 }
  0x17   :  { %4656 = vmatpush3.msra.mxu0 %v5888_v34  ;;  %4686 = vmatpush3.msra.mxu1 %v192_v63  ;;  %v227_v63 = vand.u32 4294901760, %v226_v44  ;;  %v234_v18 = vand.u32 4294901760, %v233_v55  ;;  %v241_v44 = vand.u32 4294901760, %v240_v2  ;;  %v254_v55 = vsub.f32 %v6016_v51, %v6039_v12 }
  0x18   :  { %4657 = vmatprep.subr.mxu0 %v5912_v45  ;;  %4687 = vmatprep.subr.mxu1 %v199_v7  ;;  %v261_v48 = vsub.f32 %v6026_v59, %v6046_v36 }
  0x19   :  { %4658 = vmatpush3.msra.mxu0 %v5912_v45  ;;  %4688 = vmatpush3.msra.mxu1 %v199_v7  ;;  %v125_v7 = vsub.f32 %v5992_v32, %v7923_v50 }
  0x1a   :  { %4659 = vmatprep.subr.mxu0 %v5918_v47  ;;  %4689 = vmatprep.subr.mxu1 %v206_v35 }
  0x1b   :  { %4660 = vmatpush3.msra.mxu0 %v5918_v47  ;;  %4690 = vmatpush3.msra.mxu1 %v206_v35  ;;  %v247_v35 = vsub.f32 %v6004_v40, %v6023_v56  ;;  %v126_v50 = vand.u32 4294901760, %v125_v7 }
  0x1c   :  { %4661 = vmatprep.subr.mxu0 %v5942_v57  ;;  %4691 = vmatprep.subr.mxu1 %v213_v41 }
  0x1d   :  { %4662 = vmatpush3.msra.mxu0 %v5942_v57  ;;  %4692 = vmatpush3.msra.mxu1 %v213_v41  ;;  %v116_v41 = vand.u32 4294901760, %v115_v0  ;;  %v262_v0 = vand.u32 4294901760, %v261_v48 }
  0x1e   :  { %4663 = vmatprep.subr.mxu0 %v5971_v8  ;;  %4693 = vmatprep.subr.mxu1 %v220_v54 }
  0x1f   :  { %4664 = vmatpush3.msra.mxu0 %v5971_v8  ;;  %4694 = vmatpush3.msra.mxu1 %v220_v54  ;;  %v248_v54 = vand.u32 4294901760, %v247_v35 }
  0x20   :  { %4665 = vmatprep.subr.mxu0 %v5989_v31  ;;  %4695 = vmatprep.subr.mxu1 %v227_v63 }
  0x21   :  { %4666 = vmatpush3.msra.mxu0 %v5989_v31  ;;  %4696 = vmatpush3.msra.mxu1 %v227_v63  ;;  %v255_v63 = vand.u32 4294901760, %v254_v55 }
  0x22   :  { %4667 = vmatprep.subr.mxu0 %v6001_v38  ;;  %4697 = vmatprep.subr.mxu1 %v234_v18 }
  0x23   :  { %4668 = vmatpush3.msra.mxu0 %v6001_v38  ;;  %4698 = vmatpush3.msra.mxu1 %v234_v18 }
  0x24   :  { %4669 = vmatprep.mubr.f32.mxu0 %v116_v41  ;;  %4699 = vmatprep.subr.mxu1 %v241_v44 }
  0x25   :  { %4713 = vmatprep.subr.mxu0 %v5830_v14  ;;  %4670 = vmatmul.mubr.f32.vlgmr.msra.gmra.mxu0 %v126_v50  ;;  %v13_v50 = vld [vmem:[%s7921_s0 + $0x10] sm:$0xff] }
  0x26   :  { %4700 = vmatpush3.msra.mxu1 %v241_v44  ;;  %4714 = vmatpush3.msra.mxu0 %v5830_v14  ;;  %v14_v14 = vld [vmem:[%s7921_s0 + $0x18] sm:$0xff] }
  0x27   :  { %4701 = vmatprep.subr.mxu1 %v248_v54  ;;  %4715 = vmatprep.subr.mxu0 %v5833_v15 }
  0x28   :  { %4702 = vmatpush3.msra.mxu1 %v248_v54  ;;  %4716 = vmatpush3.msra.mxu0 %v5833_v15  ;;  %v6072_v15 = vand.u32 4294901760, %v13_v50 }
  0x29   :  { %4703 = vmatprep.subr.mxu1 %v255_v63  ;;  %4717 = vmatprep.subr.mxu0 %v5838_v17 }
  0x2a   :  { %4704 = vmatpush3.msra.mxu1 %v255_v63  ;;  %4718 = vmatpush3.msra.mxu0 %v5838_v17  ;;  %v6076_v17 = vand.u32 4294901760, %v14_v14  ;;  %v3979_v63 = vld [vmem:[%s7920_s1 + $0xb0] sm:$0xff] }
  0x2b   :  { %4705 = vmatprep.subr.mxu1 %v262_v0  ;;  %4719 = vmatprep.subr.mxu0 %v5845_v19 }
  0x2c   :  { %4706 = vmatpush3.msra.mxu1 %v262_v0  ;;  %4707 = vmatprep.mubr.f32.mxu1 %v5953_v61  ;;  %v6090_v48 = vsub.f32 %v14_v14, %v6076_v17 }
  0x2d   :  { %4720 = vmatpush3.msra.mxu0 %v5845_v19  ;;  %4708 = vmatmul.mubr.f32.vlgmr.msra.gmra.mxu1 %v5956_v62  ;;  %v6085_v19 = vsub.f32 %v13_v50, %v6072_v15  ;;  %v6360_v50 = vand.u32 4294901760, %v3979_v63 }
  0x2e   :  { %4721 = vmatprep.subr.mxu0 %v5848_v20  ;;  %4751 = vmatprep.subr.mxu1 %v5801_v3 }
  0x2f   :  { %4722 = vmatpush3.msra.mxu0 %v5848_v20  ;;  %4752 = vmatpush3.msra.mxu1 %v5801_v3  ;;  %v134_v20 = vand.u32 4294901760, %v6085_v19 }
  0x30   :  { %4723 = vmatprep.subr.mxu0 %v5875_v29  ;;  %4753 = vmatprep.subr.mxu1 %v5803_v4 }
  0x31   :  { %4724 = vmatpush3.msra.mxu0 %v5875_v29  ;;  %4754 = vmatpush3.msra.mxu1 %v5803_v4  ;;  %v144_v29 = vand.u32 4294901760, %v6090_v48 }
  0x32   :  { %4725 = vmatprep.subr.mxu0 %v5885_v33  ;;  %4755 = vmatprep.subr.mxu1 %v5805_v5 }
  0x33   :  { %4726 = vmatpush3.msra.mxu0 %v5885_v33  ;;  %4756 = vmatpush3.msra.mxu1 %v5805_v5  ;;  %v135_v33 = vsub.f32 %v6085_v19, %v134_v20 }
  0x34   :  { %4727 = vmatprep.subr.mxu0 %v5909_v43  ;;  %4757 = vmatprep.subr.mxu1 %v5816_v9 }
  0x35   :  { %4728 = vmatpush3.msra.mxu0 %v5909_v43  ;;  %4758 = vmatpush3.msra.mxu1 %v5816_v9  ;;  %v145_v43 = vsub.f32 %v6090_v48, %v144_v29 }
  0x36   :  { %4729 = vmatprep.subr.mxu0 %v5915_v46  ;;  %4759 = vmatprep.subr.mxu1 %v5818_v10 }
  0x37   :  { %4730 = vmatpush3.msra.mxu0 %v5915_v46  ;;  %4760 = vmatpush3.msra.mxu1 %v5818_v10  ;;  %v136_v46 = vand.u32 4294901760, %v135_v33 }
  0x38   :  { %4731 = vmatprep.subr.mxu0 %v5933_v53  ;;  %4761 = vmatprep.subr.mxu1 %v5820_v11 }
  0x39   :  { %4732 = vmatpush3.msra.mxu0 %v5933_v53  ;;  %4762 = vmatpush3.msra.mxu1 %v5820_v11  ;;  %v146_v53 = vand.u32 4294901760, %v145_v43 }
  0x3a   :  { %4733 = vmatprep.subr.mxu0 %v5951_v60  ;;  %4763 = vmatprep.subr.mxu1 %v5835_v16 }
  0x3b   :  { %4734 = vmatpush3.msra.mxu0 %v5951_v60  ;;  %4764 = vmatpush3.msra.mxu1 %v5835_v16 }
  0x3c   :  { %4735 = vmatprep.subr.mxu0 %v5968_v6  ;;  %4765 = vmatprep.subr.mxu1 %v5860_v24 }
  0x3d   :  { %4736 = vmatpush3.msra.mxu0 %v5968_v6  ;;  %4766 = vmatpush3.msra.mxu1 %v5860_v24 }
  0x3e   :  { %4737 = vmatprep.subr.mxu0 %v5986_v30  ;;  %4767 = vmatprep.subr.mxu1 %v5869_v27 }
  0x3f   :  { %4738 = vmatpush3.msra.mxu0 %v5986_v30  ;;  %4768 = vmatpush3.msra.mxu1 %v5869_v27 }
  0x40   :  { %4739 = vmatprep.subr.mxu0 %v6004_v40  ;;  %4769 = vmatprep.subr.mxu1 %v5888_v34 }
  0x41   :  { %4672 = vmatprep.mubr.f32.mxu0 %v136_v46  ;;  %4740 = vmatpush3.msra.mxu0 %v6004_v40 }
  0x42   :  { %4770 = vmatpush3.msra.mxu1 %v5888_v34  ;;  %4673 = vmatmul.mubr.f32.gmra.mxu0 %v146_v53 }
  0x43   :  { %4741 = vmatprep.subr.mxu0 %v6016_v51  ;;  %4771 = vmatprep.subr.mxu1 %v5912_v45 }
  0x44   :  { %4742 = vmatpush3.msra.mxu0 %v6016_v51  ;;  %4772 = vmatpush3.msra.mxu1 %v5912_v45 }
  0x45   :  { %4743 = vmatprep.subr.mxu0 %v6026_v59  ;;  %4773 = vmatprep.subr.mxu1 %v5918_v47 }
  0x46   :  { %4744 = vmatpush3.msra.mxu0 %v6026_v59  ;;  %4745 = vmatprep.mubr.f32.mxu0 %v5983_v25 }
  0x47   :  { %4774 = vmatpush3.msra.mxu1 %v5918_v47  ;;  %4710 = vmatprep.mubr.f32.mxu1 %v6072_v15 }
  0x48   :  { %4746 = vmatmul.mubr.f32.vlgmr.msra.gmra.mxu0 %v5992_v32  ;;  %4775 = vmatprep.subr.mxu1 %v5942_v57 }
  0x49   :  { %4789 = vmatprep.subr.mxu0 %v5852_v21  ;;  %4711 = vmatmul.mubr.f32.gmra.mxu1 %v6076_v17 }
  0x4a   :  { %4776 = vmatpush3.msra.mxu1 %v5942_v57  ;;  %4790 = vmatpush3.msra.mxu0 %v5852_v21  ;;  %v8073_v21 = vand.u32 4294901760, %v5983_v25 }
  0x4b   :  { %4777 = vmatprep.subr.mxu1 %v5971_v8  ;;  %4791 = vmatprep.subr.mxu0 %v5855_v22 }
  0x4c   :  { %4748 = vmatprep.mubr.f32.mxu0 %v6085_v19  ;;  %4778 = vmatpush3.msra.mxu1 %v5971_v8  ;;  %v6371_v19 = vsub.f32 %v3979_v63, %v6360_v50 }
  0x4d   :  { %4792 = vmatpush3.msra.mxu0 %v5855_v22  ;;  %4779 = vmatprep.subr.mxu1 %v5989_v31  ;;  %v8074_v22 = vand.u32 4294901760, %v5992_v32 }
  0x4e   :  { %4749 = vmatmul.mubr.f32.gmra.mxu0 %v6090_v48  ;;  %4793 = vmatprep.subr.mxu0 %v5858_v23  ;;  %v6383_v43 = vand.u32 4294901760, %v6371_v19 }
  0x4f   :  { %4780 = vmatpush3.msra.mxu1 %v5989_v31  ;;  %4794 = vmatpush3.msra.mxu0 %v5858_v23 }
  0x50   :  { %4781 = vmatprep.subr.mxu1 %v6001_v38  ;;  %4795 = vmatprep.subr.mxu0 %v5867_v26  ;;  %8084 = vst [vmem:[#allocation11_spill] sm:$0xff] %v6383_v43 }
  0x51   :  { %4782 = vmatpush3.msra.mxu1 %v6001_v38  ;;  %4783 = vmatprep.mubr.f32.mxu1 %v8073_v21  ;;  %v3976_v21 = vld [vmem:[%s7920_s1 + $0x98] sm:$0xff] }
  0x52   :  { %4796 = vmatpush3.msra.mxu0 %v5867_v26  ;;  %4784 = vmatmul.mubr.f32.vlgmr.msra.gmra.mxu1 %v8074_v22  ;;  %v3985_v26 = vld [vmem:[%s7920_s1 + $0xe0] sm:$0xff] }
  0x53   :  { %4797 = vmatprep.subr.mxu0 %v5872_v28  ;;  %4827 = vmatprep.subr.mxu1 %v5801_v3 }
  0x54   :  { %4798 = vmatpush3.msra.mxu0 %v5872_v28  ;;  %4828 = vmatpush3.msra.mxu1 %v5801_v3  ;;  %v3988_v3 = vld [vmem:[%s7920_s1 + $0xf8] sm:$0xff] }
  0x55   :  { %4799 = vmatprep.subr.mxu0 %v5897_v39  ;;  %4829 = vmatprep.subr.mxu1 %v5803_v4 }
  0x56   :  { %4786 = vmatprep.mubr.f32.mxu1 %v134_v20  ;;  %4800 = vmatpush3.msra.mxu0 %v5897_v39  ;;  %v6271_v39 = vand.u32 4294901760, %v3985_v26 }
  0x57   :  { %4830 = vmatpush3.msra.mxu1 %v5803_v4  ;;  %4801 = vmatprep.subr.mxu0 %v5906_v42  ;;  %v6235_v4 = vand.u32 4294901760, %v3988_v3 }
  0x58   :  { %4787 = vmatmul.mubr.f32.gmra.mxu1 %v144_v29  ;;  %4831 = vmatprep.subr.mxu1 %v5805_v5  ;;  %v6290_v60 = vsub.f32 %v3985_v26, %v6271_v39  ;;  %v3977_v29 = vld [vmem:[%s7920_s1 + $0xa0] sm:$0xff]  ;;  %v6404_v26 = vand.u32 4294901760, %v3976_v21 }
  0x59   :  { %4802 = vmatpush3.msra.mxu0 %v5906_v42  ;;  %4832 = vmatpush3.msra.mxu1 %v5805_v5  ;;  %v3987_v5 = vld [vmem:[%s7920_s1 + $0xf0] sm:$0xff]  ;;  %v3984_v42 = vld [vmem:[%s7920_s1 + $0xd8] sm:$0xff]  ;;  %v6388_v53 = vand.u32 4294901760, %v3977_v29 }
  0x5a   :  { %4803 = vmatprep.subr.mxu0 %v5930_v52  ;;  %4833 = vmatprep.subr.mxu1 %v5816_v9  ;;  %v6308_v30 = vand.u32 4294901760, %v6290_v60 }
  0x5b   :  { %4804 = vmatpush3.msra.mxu0 %v5930_v52  ;;  %4834 = vmatpush3.msra.mxu1 %v5816_v9  ;;  %v6241_v9 = vsub.f32 %v3988_v3, %v6235_v4  ;;  %v1010_v3 = vsub.f32 %v6371_v19, %v6383_v43 }
  0x5c   :  { %4805 = vmatprep.subr.mxu0 %v5945_v58  ;;  %4835 = vmatprep.subr.mxu1 %v5818_v10  ;;  %8078 = vst [vmem:[#allocation5_spill] sm:$0xff] %v6308_v30 }
  0x5d   :  { %4806 = vmatpush3.msra.mxu0 %v5945_v58  ;;  %4836 = vmatpush3.msra.mxu1 %v5818_v10  ;;  %v6243_v10 = vand.u32 4294901760, %v3987_v5 }
  0x5e   :  { %4807 = vmatprep.subr.mxu0 %v5962_v1  ;;  %4837 = vmatprep.subr.mxu1 %v5820_v11 }
  0x5f   :  { %4808 = vmatpush3.msra.mxu0 %v5962_v1  ;;  %4838 = vmatpush3.msra.mxu1 %v5820_v11  ;;  %v3986_v11 = vld [vmem:[%s7920_s1 + $0xe8] sm:$0xff]  ;;  %v6254_v23 = vsub.f32 %v3987_v5, %v6243_v10 }
  0x60   :  { %4809 = vmatprep.subr.mxu0 %v5977_v13  ;;  %4839 = vmatprep.subr.mxu1 %v5835_v16 }
  0x61   :  { %4810 = vmatpush3.msra.mxu0 %v5977_v13  ;;  %4840 = vmatpush3.msra.mxu1 %v5835_v16  ;;  %v6251_v16 = vand.u32 4294901760, %v6241_v9  ;;  %v6266_v28 = vand.u32 4294901760, %v6254_v23 }
  0x62   :  { %4811 = vmatprep.subr.mxu0 %v5998_v37  ;;  %4841 = vmatprep.subr.mxu1 %v5860_v24 }
  0x63   :  { %4812 = vmatpush3.msra.mxu0 %v5998_v37  ;;  %4842 = vmatpush3.msra.mxu1 %v5860_v24  ;;  %8075 = vst [vmem:[#allocation2_spill] sm:$0xff] %v6251_v16  ;;  %v6256_v24 = vand.u32 4294901760, %v3986_v11  ;;  %8076 = vst [vmem:[#allocation3_spill] sm:$0xff] %v6266_v28 }
  0x64   :  { %4813 = vmatprep.subr.mxu0 %v6011_v49  ;;  %4843 = vmatprep.subr.mxu1 %v5869_v27 }
  0x65   :  { %4814 = vmatpush3.msra.mxu0 %v6011_v49  ;;  %4844 = vmatpush3.msra.mxu1 %v5869_v27  ;;  %v947_v27 = vsub.f32 %v6241_v9, %v6251_v16  ;;  %v968_v49 = vsub.f32 %v6290_v60, %v6308_v30 }
  0x66   :  { %4815 = vmatprep.subr.mxu0 %v6023_v56  ;;  %4845 = vmatprep.subr.mxu1 %v5888_v34 }
  0x67   :  { %4816 = vmatpush3.msra.mxu0 %v6023_v56  ;;  %4846 = vmatpush3.msra.mxu1 %v5888_v34  ;;  %v6269_v34 = vsub.f32 %v3986_v11, %v6256_v24  ;;  %v948_v52 = vand.u32 4294901760, %v947_v27  ;;  %v969_v7 = vand.u32 4294901760, %v968_v49  ;;  %v6401_v11 = vsub.f32 %v3977_v29, %v6388_v53  ;;  %v3975_v27 = vld [vmem:[%s7920_s1 + $0x90] sm:$0xff] }
  0x68   :  { %4817 = vmatprep.subr.mxu0 %v6039_v12  ;;  %4847 = vmatprep.subr.mxu1 %v5912_v45 }
  0x69   :  { %4818 = vmatpush3.msra.mxu0 %v6039_v12  ;;  %4848 = vmatpush3.msra.mxu1 %v5912_v45  ;;  %v3983_v45 = vld [vmem:[%s7920_s1 + $0xd0] sm:$0xff]  ;;  %v6287_v58 = vand.u32 4294901760, %v6269_v34 }
  0x6a   :  { %4819 = vmatprep.subr.mxu0 %v6046_v36  ;;  %4849 = vmatprep.subr.mxu1 %v5918_v47  ;;  %v6298_v1 = vand.u32 4294901760, %v3983_v45 }
  0x6b   :  { %4820 = vmatpush3.msra.mxu0 %v6046_v36  ;;  %4821 = vmatprep.mubr.f32.mxu0 %v5953_v61  ;;  %8077 = vst [vmem:[#allocation4_spill] sm:$0xff] %v6287_v58  ;;  %v961_v25 = vsub.f32 %v6269_v34, %v6287_v58  ;;  %v3980_v36 = vld [vmem:[%s7920_s1 + $0xb8] sm:$0xff] }
  0x6c   :  { %4850 = vmatpush3.msra.mxu1 %v5918_v47  ;;  %4822 = vmatmul.mubr.f32.vlgmr.msra.gmra.mxu0 %v5956_v62  ;;  %v3982_v47 = vld [vmem:[%s7920_s1 + $0xc8] sm:$0xff]  ;;  %v6314_v32 = vsub.f32 %v3983_v45, %v6298_v1  ;;  %v6348_v41 = vand.u32 4294901760, %v3980_v36 }
  0x6d   :  { %4851 = vmatprep.subr.mxu1 %v5942_v57  ;;  %4824 = vmatprep.mubr.f32.mxu0 %v6072_v15  ;;  %v6300_v6 = vand.u32 4294901760, %v3982_v47  ;;  %v962_v40 = vand.u32 4294901760, %v961_v25 }
  0x6e   :  { %4852 = vmatpush3.msra.mxu1 %v5942_v57  ;;  %4859 = vmatprep.mubr.f32.mxu1 %v5953_v61  ;;  %v954_v57 = vsub.f32 %v6254_v23, %v6266_v28  ;;  %v3981_v61 = vld [vmem:[%s7920_s1 + $0xc0] sm:$0xff]  ;;  %v6329_v56 = vand.u32 4294901760, %v6314_v32  ;;  %v6358_v0 = vsub.f32 %v3980_v36, %v6348_v41 }
  0x6f   :  { %4853 = vmatprep.subr.mxu1 %v5971_v8  ;;  %4865 = vmatprep.subr.mxu0 %v6235_v4  ;;  %v6317_v37 = vsub.f32 %v3982_v47, %v6300_v6  ;;  %v6413_v47 = vand.u32 4294901760, %v6401_v11 }
  0x70   :  { %4854 = vmatpush3.msra.mxu1 %v5971_v8  ;;  %4825 = vmatmul.mubr.f32.gmra.mxu0 %v6076_v17  ;;  %v6302_v8 = vand.u32 4294901760, %v3981_v61  ;;  %v955_v13 = vand.u32 4294901760, %v954_v57  ;;  %8080 = vst [vmem:[#allocation7_spill] sm:$0xff] %v6329_v56  ;;  %v982_v18 = vsub.f32 %v6314_v32, %v6329_v56  ;;  %v6419_v57 = vsub.f32 %v3976_v21, %v6404_v26 }
  0x71   :  { %4855 = vmatprep.subr.mxu1 %v5989_v31  ;;  %4866 = vmatpush3.msra.mxu0 %v6235_v4  ;;  %v6332_v59 = vand.u32 4294901760, %v6317_v37  ;;  %8086 = vst [vmem:[#allocation13_spill] sm:$0xff] %v6413_v47  ;;  %v1024_v25 = vsub.f32 %v6401_v11, %v6413_v47 }
  0x72   :  { %4856 = vmatpush3.msra.mxu1 %v5989_v31  ;;  %4867 = vmatprep.subr.mxu0 %v6243_v10  ;;  %v983_v55 = vand.u32 4294901760, %v982_v18  ;;  %8087 = vst [vmem:[#allocation14_spill] sm:$0xff] %v6419_v57 }
  0x73   :  { %4857 = vmatprep.subr.mxu1 %v6001_v38  ;;  %4868 = vmatpush3.msra.mxu0 %v6243_v10  ;;  %8081 = vst [vmem:[#allocation8_spill] sm:$0xff] %v6332_v59  ;;  %v989_v35 = vsub.f32 %v6317_v37, %v6332_v59  ;;  %v1025_v18 = vand.u32 4294901760, %v1024_v25 }
  0x74   :  { %4858 = vmatpush3.msra.mxu1 %v6001_v38  ;;  %4869 = vmatprep.subr.mxu0 %v6256_v24  ;;  %v6320_v38 = vsub.f32 %v3981_v61, %v6302_v8  ;;  %v3974_v61 = vld [vmem:[%s7920_s1 + $0x88] sm:$0xff] }
  0x75   :  { %4860 = vmatmul.mubr.f32.vlgmr.msra.gmra.mxu1 %v5956_v62  ;;  %4870 = vmatpush3.msra.mxu0 %v6256_v24  ;;  %v6296_v62 = vand.u32 4294901760, %v3984_v42  ;;  %v990_v14 = vand.u32 4294901760, %v989_v35  ;;  %v6430_v49 = vand.u32 4294901760, %v3974_v61 }
  0x76   :  { %4862 = vmatprep.mubr.f32.mxu1 %v6072_v15  ;;  %4871 = vmatprep.subr.mxu0 %v6271_v39  ;;  %v6335_v2 = vand.u32 4294901760, %v6320_v38  ;;  %v3978_v15 = vld [vmem:[%s7920_s1 + $0xa8] sm:$0xff] }
  0x77   :  { %4872 = vmatpush3.msra.mxu0 %v6271_v39  ;;  %4903 = vmatprep.subr.mxu1 %v948_v52  ;;  %v6311_v31 = vsub.f32 %v3984_v42, %v6296_v62  ;;  %v6373_v48 = vand.u32 4294901760, %v3978_v15  ;;  %v1011_v42 = vand.u32 4294901760, %v1010_v3  ;;  %v6444_v36 = vsub.f32 %v3974_v61, %v6430_v49 }
  0x78   :  { %4904 = vmatpush3.msra.mxu1 %v948_v52  ;;  %4873 = vmatprep.subr.mxu0 %v6296_v62  ;;  %8082 = vst [vmem:[#allocation9_spill] sm:$0xff] %v6335_v2  ;;  %v996_v54 = vsub.f32 %v6320_v38, %v6335_v2  ;;  %v6415_v52 = vand.u32 4294901760, %v3975_v27 }
  0x79   :  { %4863 = vmatmul.mubr.f32.gmra.mxu1 %v6076_v17  ;;  %4905 = vmatprep.subr.mxu1 %v955_v13  ;;  %v6326_v51 = vand.u32 4294901760, %v6311_v31  ;;  %v6368_v17 = vand.u32 4294901760, %v6358_v0  ;;  %v6386_v46 = vsub.f32 %v3978_v15, %v6373_v48  ;;  %8091 = vst [vmem:[#allocation18_spill] sm:$0xff] %v6444_v36  ;;  %v6455_v63 = vand.u32 4294901760, %v6444_v36 }
  0x7a   :  { %4906 = vmatpush3.msra.mxu1 %v955_v13  ;;  %4874 = vmatpush3.msra.mxu0 %v6296_v62  ;;  %v997_v20 = vand.u32 4294901760, %v996_v54 }
  0x7b   :  { %8079 = vst [vmem:[#allocation6_spill] sm:$0xff] %v6326_v51  ;;  %4907 = vmatprep.subr.mxu1 %v962_v40  ;;  %4875 = vmatprep.subr.mxu0 %v6298_v1  ;;  %v975_v12 = vsub.f32 %v6311_v31, %v6326_v51  ;;  %8083 = vst [vmem:[#allocation10_spill] sm:$0xff] %v6368_v17  ;;  %v1003_v33 = vsub.f32 %v6358_v0, %v6368_v17  ;;  %v6398_v5 = vand.u32 4294901760, %v6386_v46 }
  0x7c   :  { %4908 = vmatpush3.msra.mxu1 %v962_v40  ;;  %4876 = vmatpush3.msra.mxu0 %v6298_v1  ;;  %v6428_v40 = vsub.f32 %v3975_v27, %v6415_v52  ;;  %8092 = vst [vmem:[#allocation19_spill] sm:$0xff] %v6455_v63  ;;  %v1045_v29 = vsub.f32 %v6444_v36, %v6455_v63 }
  0x7d   :  { %4909 = vmatprep.subr.mxu1 %v969_v7  ;;  %v976_v44 = vand.u32 4294901760, %v975_v12  ;;  %4877 = vmatprep.subr.mxu0 %v6300_v6  ;;  %v1004_v22 = vand.u32 4294901760, %v1003_v33  ;;  %8085 = vst [vmem:[#allocation12_spill] sm:$0xff] %v6398_v5  ;;  %v1017_v45 = vsub.f32 %v6386_v46, %v6398_v5  ;;  %v3973_v12 = vld [vmem:[%s7920_s1 + $0x80] sm:$0xff] }
  0x7e   :  { %4910 = vmatpush3.msra.mxu1 %v969_v7  ;;  %4878 = vmatpush3.msra.mxu0 %v6300_v6  ;;  %8088 = vst [vmem:[#allocation15_spill] sm:$0xff] %v6428_v40  ;;  %v6434_v7 = vand.u32 4294901760, %v6419_v57  ;;  %v6441_v35 = vand.u32 4294901760, %v6428_v40  ;;  %v1046_v21 = vand.u32 4294901760, %v1045_v29 }
  0x7f   :  { %4911 = vmatprep.subr.mxu1 %v976_v44  ;;  %4879 = vmatprep.subr.mxu0 %v6302_v8  ;;  %v1018_v13 = vand.u32 4294901760, %v1017_v45 }
  0x80   :  { %4912 = vmatpush3.msra.mxu1 %v976_v44  ;;  %4880 = vmatpush3.msra.mxu0 %v6302_v8  ;;  %8089 = vst [vmem:[#allocation16_spill] sm:$0xff] %v6434_v7  ;;  %8090 = vst [vmem:[#allocation17_spill] sm:$0xff] %v6441_v35  ;;  %v6446_v44 = vand.u32 4294901760, %v3973_v12  ;;  %v1038_v54 = vsub.f32 %v6428_v40, %v6441_v35 }
  0x81   :  { %4913 = vmatprep.subr.mxu1 %v983_v55  ;;  %4881 = vmatprep.subr.mxu0 %v6348_v41 }
  0x82   :  { %4914 = vmatpush3.msra.mxu1 %v983_v55  ;;  %4882 = vmatpush3.msra.mxu0 %v6348_v41  ;;  %v1031_v55 = vsub.f32 %v6419_v57, %v6434_v7 }
  0x83   :  { %4915 = vmatprep.subr.mxu1 %v990_v14  ;;  %4883 = vmatprep.subr.mxu0 %v6360_v50 }
  0x84   :  { %4916 = vmatpush3.msra.mxu1 %v990_v14  ;;  %4884 = vmatpush3.msra.mxu0 %v6360_v50  ;;  %v6458_v14 = vsub.f32 %v3973_v12, %v6446_v44  ;;  %v1032_v15 = vand.u32 4294901760, %v1031_v55 }
  0x85   :  { %4917 = vmatprep.subr.mxu1 %v997_v20  ;;  %4885 = vmatprep.subr.mxu0 %v6373_v48 }
  0x86   :  { %4918 = vmatpush3.msra.mxu1 %v997_v20  ;;  %4886 = vmatpush3.msra.mxu0 %v6373_v48  ;;  %8093 = vst [vmem:[#allocation20_spill] sm:$0xff] %v6458_v14  ;;  %v1039_v20 = vand.u32 4294901760, %v1038_v54  ;;  %v6465_v33 = vand.u32 4294901760, %v6458_v14 }
  0x87   :  { %4919 = vmatprep.subr.mxu1 %v1004_v22  ;;  %4887 = vmatprep.subr.mxu0 %v6388_v53 }
  0x88   :  { %4920 = vmatpush3.msra.mxu1 %v1004_v22  ;;  %4888 = vmatpush3.msra.mxu0 %v6388_v53  ;;  %8094 = vst [vmem:[#allocation21_spill] sm:$0xff] %v6465_v33  ;;  %v1052_v22 = vsub.f32 %v6458_v14, %v6465_v33 }
  0x89   :  { %4921 = vmatprep.subr.mxu1 %v1011_v42  ;;  %4889 = vmatprep.subr.mxu0 %v6404_v26 }
  0x8a   :  { %4922 = vmatpush3.msra.mxu1 %v1011_v42  ;;  %4890 = vmatpush3.msra.mxu0 %v6404_v26  ;;  %v1053_v3 = vand.u32 4294901760, %v1052_v22 }
  0x8b   :  { %4923 = vmatprep.subr.mxu1 %v1018_v13  ;;  %4891 = vmatprep.subr.mxu0 %v6415_v52 }
  0x8c   :  { %4924 = vmatpush3.msra.mxu1 %v1018_v13  ;;  %4892 = vmatpush3.msra.mxu0 %v6415_v52 }
  0x8d   :  { %4925 = vmatprep.subr.mxu1 %v1025_v18  ;;  %4893 = vmatprep.subr.mxu0 %v6430_v49 }
  0x8e   :  { %4926 = vmatpush3.msra.mxu1 %v1025_v18  ;;  %4894 = vmatpush3.msra.mxu0 %v6430_v49 }
  0x8f   :  { %4927 = vmatprep.subr.mxu1 %v1032_v15  ;;  %4895 = vmatprep.subr.mxu0 %v6446_v44 }
  0x90   :  { %4928 = vmatpush3.msra.mxu1 %v1032_v15  ;;  %4896 = vmatpush3.msra.mxu0 %v6446_v44 }
  0x91   :  { %4929 = vmatprep.subr.mxu1 %v1039_v20  ;;  %4941 = vmatprep.subr.mxu0 %v6241_v9 }
  0x92   :  { %4930 = vmatpush3.msra.mxu1 %v1039_v20 }
  0x93   :  { %4931 = vmatprep.subr.mxu1 %v1046_v21 }
  0x94   :  { %4932 = vmatpush3.msra.mxu1 %v1046_v21 }
  0x95   :  { %4933 = vmatprep.subr.mxu1 %v1053_v3 }
  0x96   :  { %4934 = vmatpush3.msra.mxu1 %v1053_v3 }
  0x97   :  { %4979 = vmatprep.subr.mxu1 %v6235_v4 }
  0xe5   :  { %v4671_v27 = vpop.f32.mrf.mxu0 }
  0xe7   :  { %v118_v42 = vpop.f32.mrf.mxu0 }
  0xed   :  { %v4709_v13 = vpop.f32.mrf.mxu1 }
  0xee   :  { %v306_v21 = vadd.f32 %v4709_v13, %v4671_v27 }
  0xef   :  { %v299_v12 = vpop.f32.mrf.mxu1 }
  0xf0   :  { %v300_v35 = vadd.f32 %v299_v12, %v118_v42 }
 0x102   :  { %v4674_v45 = vpop.f32.mrf.mxu0 }
 0x104   :  { %v138_v61 = vpop.f32.mrf.mxu0 }
 0x108   :  { %v4747_v25 = vpop.f32.mrf.mxu0 }
 0x109   :  { %v4712_v18 = vpop.f32.mrf.mxu1  ;;  %v429_v7 = vadd.f32 %v4747_v25, %v306_v21  ;;  %v4000_v21 = vld [vmem:[%s7920_s1 + $0x158] sm:$0xff] }
 0x10a   :  { %v421_v55 = vpop.f32.mrf.mxu0  ;;  %v318_v47 = vadd.f32 %v4712_v18, %v4674_v45 }
 0x10b   :  { %v311_v54 = vpop.f32.mrf.mxu1  ;;  %v422_v5 = vadd.f32 %v421_v55, %v300_v35 }
 0x10c   :  { %v312_v43 = vadd.f32 %v311_v54, %v138_v61 }
 0x10e   :  { %v4750_v15 = vpop.f32.mrf.mxu0 }
 0x10f   :  { %v443_v56 = vadd.f32 %v4750_v15, %v318_v47 }
 0x110   :  { %v435_v20 = vpop.f32.mrf.mxu0 }
 0x111   :  { %v436_v28 = vadd.f32 %v435_v20, %v312_v43 }
 0x112   :  { %v4785_v29 = vpop.f32.mrf.mxu1 }
 0x113   :  { %v540_v17 = vadd.f32 %v4785_v29, %v429_v7 }
 0x114   :  { %v531_v22 = vpop.f32.mrf.mxu1 }
 0x115   :  { %v532_v51 = vadd.f32 %v531_v22, %v422_v5  ;;  %v4001_v22 = vld [vmem:[%s7920_s1 + $0x160] sm:$0xff] }
 0x118   :  { %v4788_v63 = vpop.f32.mrf.mxu1 }
 0x119   :  { %v556_v16 = vadd.f32 %v4788_v63, %v443_v56 }
 0x11a   :  { %v547_v2 = vpop.f32.mrf.mxu1 }
 0x11b   :  { %v548_v13 = vadd.f32 %v547_v2, %v436_v28 }
 0x12c   :  { %v4823_v33 = vpop.f32.mrf.mxu0 }
 0x12d   :  { %v681_v30 = vadd.f32 %v4823_v33, %v540_v17 }
 0x12e   :  { %v674_v3 = vpop.f32.mrf.mxu0 }
 0x12f   :  { %v675_v14 = vadd.f32 %v674_v3, %v532_v51  ;;  %v3999_v3 = vld [vmem:[%s7920_s1 + $0x150] sm:$0xff] }
 0x130   :  { %v4826_v59 = vpop.f32.mrf.mxu0 }
 0x131   :  { %v693_v57 = vadd.f32 %v4826_v59, %v556_v16 }
 0x132   :  { %v686_v40 = vpop.f32.mrf.mxu0 }
 0x133   :  { %v687_v35 = vadd.f32 %v686_v40, %v548_v13  ;;  %v6689_v13 = vand.u32 4294901760, %v4000_v21 }
 0x135   :  { %v4861_v58 = vpop.f32.mrf.mxu1 }
 0x136   :  { %v786_v36 = vadd.f32 %v4861_v58, %v681_v30 }
 0x137   :  { %v779_v27 = vpop.f32.mrf.mxu1 }
 0x138   :  { %v802_v42 = vmax.f32 %v786_v36, 0.0  ;;  %v780_v25 = vadd.f32 %v779_v27, %v675_v14  ;;  %v6687_v27 = vand.u32 4294901760, %v4001_v22 }
 0x139   :  { %v4864_v45 = vpop.f32.mrf.mxu1 }
 0x13a   :  { %v6474_v61 = vand.u32 4294901760, %v802_v42  ;;  %v801_v7 = vmax.f32 %v780_v25, 0.0  ;;  %v798_v12 = vadd.f32 %v4864_v45, %v693_v57  ;;  %v3998_v25 = vld [vmem:[%s7920_s1 + $0x148] sm:$0xff] }
 0x13b   :  { %v791_v47 = vpop.f32.mrf.mxu1 }
 0x13c   :  { %v6477_v17 = vsub.f32 %v802_v42, %v6474_v61  ;;  %v6479_v43 = vand.u32 4294901760, %v801_v7  ;;  %v804_v51 = vmax.f32 %v798_v12, 0.0  ;;  %v792_v58 = vadd.f32 %v791_v47, %v687_v35 }
 0x13d   :  { %v6691_v42 = vand.u32 4294901760, %v3999_v3  ;;  %v6709_v12 = vsub.f32 %v4001_v22, %v6687_v27  ;;  %v6712_v47 = vsub.f32 %v4000_v21, %v6689_v13  ;;  %v3991_v21 = vld [vmem:[%s7920_s1 + $0x110] sm:$0xff] }
 0x13e   :  { %v915_v30 = vand.u32 4294901760, %v6477_v17  ;;  %v904_v16 = vsub.f32 %v801_v7, %v6479_v43  ;;  %v6483_v28 = vand.u32 4294901760, %v804_v51  ;;  %v803_v56 = vmax.f32 %v792_v58, 0.0  ;;  %4935 = vmatprep.mubr.f32.mxu1 %v6479_v43 }
 0x13f   :  { %4936 = vmatmul.mubr.f32.vlgmr.msra.gmra.mxu1 %v6474_v61  ;;  %v6706_v7 = vand.u32 4294901760, %v3998_v25 }
 0x140   :  { %v6488_v59 = vsub.f32 %v804_v51, %v6483_v28  ;;  %v6490_v2 = vand.u32 4294901760, %v803_v56  ;;  %4980 = vmatpush3.msra.mxu1 %v6235_v4  ;;  %v905_v5 = vand.u32 4294901760, %v904_v16  ;;  %v916_v57 = vsub.f32 %v6477_v17, %v915_v30 }
 0x141   :  { %4981 = vmatprep.subr.mxu1 %v6243_v10 }
 0x142   :  { %v6498_v40 = vsub.f32 %v803_v56, %v6490_v2  ;;  %4982 = vmatpush3.msra.mxu1 %v6243_v10  ;;  %4938 = vmatprep.mubr.f32.mxu1 %v6490_v2  ;;  %v906_v36 = vsub.f32 %v904_v16, %v905_v5  ;;  %v935_v63 = vand.u32 4294901760, %v6488_v59  ;;  %v917_v18 = vand.u32 4294901760, %v916_v57 }
 0x143   :  { %4983 = vmatprep.subr.mxu1 %v6256_v24  ;;  %4939 = vmatmul.mubr.f32.gmra.mxu1 %v6483_v28 }
 0x144   :  { %4984 = vmatpush3.msra.mxu1 %v6256_v24  ;;  %5011 = vmatprep.mubr.f32.mxu1 %v905_v5  ;;  %v907_v14 = vand.u32 4294901760, %v906_v36  ;;  %v925_v33 = vand.u32 4294901760, %v6498_v40  ;;  %v936_v54 = vsub.f32 %v6488_v59, %v935_v63 }
 0x145   :  { %4985 = vmatprep.subr.mxu1 %v6271_v39 }
 0x146   :  { %4986 = vmatpush3.msra.mxu1 %v6271_v39  ;;  %4897 = vmatprep.mubr.f32.mxu0 %v907_v14  ;;  %v926_v55 = vsub.f32 %v6498_v40, %v925_v33  ;;  %v937_v29 = vand.u32 4294901760, %v936_v54 }
 0x147   :  { %4987 = vmatprep.subr.mxu1 %v6296_v62  ;;  %4898 = vmatmul.mubr.f32.vlgmr.msra.gmra.mxu0 %v917_v18 }
 0x148   :  { %4942 = vmatpush3.msra.mxu0 %v6241_v9  ;;  %4988 = vmatpush3.msra.mxu1 %v6296_v62  ;;  %v927_v15 = vand.u32 4294901760, %v926_v55  ;;  %v8095_v9 = vld [vmem:[#allocation14_spill] sm:$0xff] }
 0x149   :  { %4943 = vmatprep.subr.mxu0 %v6254_v23  ;;  %4989 = vmatprep.subr.mxu1 %v6298_v1 }
 0x14a   :  { %4944 = vmatpush3.msra.mxu0 %v6254_v23  ;;  %4990 = vmatpush3.msra.mxu1 %v6298_v1  ;;  %v8096_v23 = vld [vmem:[#allocation15_spill] sm:$0xff] }
 0x14b   :  { %4900 = vmatprep.mubr.f32.mxu0 %v927_v15  ;;  %4945 = vmatprep.subr.mxu0 %v6269_v34  ;;  %v3996_v15 = vld [vmem:[%s7920_s1 + $0x138] sm:$0xff] }
 0x14c   :  { %4991 = vmatprep.subr.mxu1 %v6300_v6  ;;  %4901 = vmatmul.mubr.f32.gmra.mxu0 %v937_v29 }
 0x14d   :  { %4946 = vmatpush3.msra.mxu0 %v6269_v34  ;;  %4992 = vmatpush3.msra.mxu1 %v6300_v6  ;;  %v8097_v34 = vld [vmem:[#allocation18_spill] sm:$0xff] }
 0x14e   :  { %4947 = vmatprep.subr.mxu0 %v6290_v60  ;;  %4973 = vmatprep.mubr.f32.mxu0 %v904_v16  ;;  %v6728_v16 = vand.u32 4294901760, %v6709_v12 }
 0x14f   :  { %4993 = vmatprep.subr.mxu1 %v6302_v8  ;;  %4948 = vmatpush3.msra.mxu0 %v6290_v60  ;;  %v8102_v60 = vld [vmem:[#allocation5_spill] sm:$0xff] }
 0x150   :  { %4994 = vmatpush3.msra.mxu1 %v6302_v8  ;;  %4949 = vmatprep.subr.mxu0 %v6311_v31  ;;  %v1759_v57 = vsub.f32 %v6709_v12, %v6728_v16 }
 0x151   :  { %4995 = vmatprep.subr.mxu1 %v6348_v41  ;;  %4950 = vmatpush3.msra.mxu0 %v6311_v31  ;;  %v8107_v31 = vld [vmem:[#allocation10_spill] sm:$0xff] }
 0x152   :  { %4996 = vmatpush3.msra.mxu1 %v6348_v41  ;;  %4951 = vmatprep.subr.mxu0 %v6314_v32  ;;  %v1760_v14 = vand.u32 4294901760, %v1759_v57 }
 0x153   :  { %4997 = vmatprep.subr.mxu1 %v6360_v50  ;;  %4952 = vmatpush3.msra.mxu0 %v6314_v32  ;;  %v8108_v32 = vld [vmem:[#allocation11_spill] sm:$0xff] }
 0x154   :  { %4998 = vmatpush3.msra.mxu1 %v6360_v50  ;;  %4953 = vmatprep.subr.mxu0 %v6317_v37 }
 0x155   :  { %4999 = vmatprep.subr.mxu1 %v6373_v48  ;;  %4954 = vmatpush3.msra.mxu0 %v6317_v37  ;;  %v8109_v37 = vld [vmem:[#allocation12_spill] sm:$0xff] }
 0x156   :  { %5000 = vmatpush3.msra.mxu1 %v6373_v48  ;;  %4955 = vmatprep.subr.mxu0 %v6320_v38 }
 0x157   :  { %5001 = vmatprep.subr.mxu1 %v6388_v53  ;;  %4956 = vmatpush3.msra.mxu0 %v6320_v38  ;;  %v8110_v38 = vld [vmem:[#allocation13_spill] sm:$0xff] }
 0x158   :  { %5002 = vmatpush3.msra.mxu1 %v6388_v53  ;;  %4957 = vmatprep.subr.mxu0 %v6358_v0 }
 0x159   :  { %5003 = vmatprep.subr.mxu1 %v6404_v26  ;;  %4958 = vmatpush3.msra.mxu0 %v6358_v0  ;;  %v8112_v0 = vld [vmem:[#allocation17_spill] sm:$0xff] }
 0x15a   :  { %5004 = vmatpush3.msra.mxu1 %v6404_v26  ;;  %4959 = vmatprep.subr.mxu0 %v6371_v19 }
 0x15b   :  { %5005 = vmatprep.subr.mxu1 %v6415_v52  ;;  %4960 = vmatpush3.msra.mxu0 %v6371_v19  ;;  %v8114_v19 = vld [vmem:[#allocation21_spill] sm:$0xff] }
 0x15c   :  { %5006 = vmatpush3.msra.mxu1 %v6415_v52  ;;  %4961 = vmatprep.subr.mxu0 %v6386_v46 }
 0x15d   :  { %5007 = vmatprep.subr.mxu1 %v6430_v49  ;;  %4962 = vmatpush3.msra.mxu0 %v6386_v46 }
 0x15e   :  { %5008 = vmatpush3.msra.mxu1 %v6430_v49  ;;  %4963 = vmatprep.subr.mxu0 %v6401_v11 }
 0x15f   :  { %5009 = vmatprep.subr.mxu1 %v6446_v44  ;;  %4964 = vmatpush3.msra.mxu0 %v6401_v11 }
 0x160   :  { %5010 = vmatpush3.msra.mxu1 %v6446_v44  ;;  %4965 = vmatprep.subr.mxu0 %v8095_v9 }
 0x161   :  { %5012 = vmatmul.mubr.f32.vlgmr.msra.gmra.mxu1 %v915_v30  ;;  %5055 = vmatprep.subr.mxu1 %v6235_v4  ;;  %v6724_v30 = vsub.f32 %v3998_v25, %v6706_v7 }
 0x162   :  { %4966 = vmatpush3.msra.mxu0 %v8095_v9  ;;  %5014 = vmatprep.mubr.f32.mxu1 %v925_v33  ;;  %v3997_v33 = vld [vmem:[%s7920_s1 + $0x140] sm:$0xff] }
 0x163   :  { %5056 = vmatpush3.msra.mxu1 %v6235_v4  ;;  %4967 = vmatprep.subr.mxu0 %v8096_v23  ;;  %v8098_v4 = vld [vmem:[#allocation20_spill] sm:$0xff]  ;;  %v6740_v5 = vand.u32 4294901760, %v6724_v30  ;;  %v6757_v54 = vand.u32 4294901760, %v3997_v33 }
 0x164   :  { %5057 = vmatprep.subr.mxu1 %v6243_v10  ;;  %4968 = vmatpush3.msra.mxu0 %v8096_v23  ;;  %8118 = vst [vmem:[#allocation20_spill] sm:$0xff] %v6728_v16  ;;  %v6767_v23 = vand.u32 4294901760, %v3996_v15 }
 0x165   :  { %5058 = vmatpush3.msra.mxu1 %v6243_v10  ;;  %4969 = vmatprep.subr.mxu0 %v8097_v34  ;;  %v8099_v10 = vld [vmem:[#allocation2_spill] sm:$0xff]  ;;  %v1780_v55 = vsub.f32 %v6724_v30, %v6740_v5  ;;  %v6765_v9 = vsub.f32 %v3997_v33, %v6757_v54 }
 0x166   :  { %5015 = vmatmul.mubr.f32.gmra.mxu1 %v935_v63  ;;  %5059 = vmatprep.subr.mxu1 %v6256_v24 }
 0x167   :  { %4970 = vmatpush3.msra.mxu0 %v8097_v34  ;;  %5060 = vmatpush3.msra.mxu1 %v6256_v24  ;;  %v8100_v24 = vld [vmem:[#allocation3_spill] sm:$0xff]  ;;  %v3995_v34 = vld [vmem:[%s7920_s1 + $0x130] sm:$0xff] }
 0x168   :  { %5087 = vmatprep.mubr.f32.mxu1 %v6479_v43  ;;  %4971 = vmatprep.subr.mxu0 %v8098_v4 }
 0x169   :  { %5061 = vmatprep.subr.mxu1 %v6271_v39  ;;  %4972 = vmatpush3.msra.mxu0 %v8098_v4  ;;  %v1781_v4 = vand.u32 4294901760, %v1780_v55 }
 0x16a   :  { %5062 = vmatpush3.msra.mxu1 %v6271_v39  ;;  %4974 = vmatmul.mubr.f32.vlgmr.msra.gmra.mxu0 %v6477_v17  ;;  %v8101_v39 = vld [vmem:[#allocation4_spill] sm:$0xff]  ;;  %v6715_v17 = vsub.f32 %v3999_v3, %v6691_v42 }
 0x16b   :  { %5017 = vmatprep.subr.mxu0 %v8099_v10  ;;  %5063 = vmatprep.subr.mxu1 %v6296_v62  ;;  %8121 = vst [vmem:[#allocation4_spill] sm:$0xff] %v6740_v5 }
 0x16c   :  { %4976 = vmatprep.mubr.f32.mxu0 %v6498_v40  ;;  %5018 = vmatpush3.msra.mxu0 %v8099_v10  ;;  %v6734_v56 = vand.u32 4294901760, %v6715_v17  ;;  %v6775_v10 = vand.u32 4294901760, %v6765_v9 }
 0x16d   :  { %5064 = vmatpush3.msra.mxu1 %v6296_v62  ;;  %5019 = vmatprep.subr.mxu0 %v8100_v24  ;;  %v8103_v62 = vld [vmem:[#allocation6_spill] sm:$0xff] }
 0x16e   :  { %5065 = vmatprep.subr.mxu1 %v6298_v1  ;;  %5020 = vmatpush3.msra.mxu0 %v8100_v24  ;;  %8120 = vst [vmem:[#allocation3_spill] sm:$0xff] %v6734_v56  ;;  %v1773_v63 = vsub.f32 %v6715_v17, %v6734_v56  ;;  %8122 = vst [vmem:[#allocation5_spill] sm:$0xff] %v6775_v10  ;;  %v6778_v24 = vsub.f32 %v3996_v15, %v6767_v23 }
 0x16f   :  { %5066 = vmatpush3.msra.mxu1 %v6298_v1  ;;  %4977 = vmatmul.mubr.f32.gmra.mxu0 %v6488_v59  ;;  %v8104_v1 = vld [vmem:[#allocation7_spill] sm:$0xff] }
 0x170   :  { %5021 = vmatprep.subr.mxu0 %v8101_v39  ;;  %5067 = vmatprep.subr.mxu1 %v6300_v6  ;;  %v1774_v29 = vand.u32 4294901760, %v1773_v63 }
 0x171   :  { %5022 = vmatpush3.msra.mxu0 %v8101_v39  ;;  %5049 = vmatprep.mubr.f32.mxu0 %v6479_v43  ;;  %v6780_v39 = vand.u32 4294901760, %v3995_v34 }
 0x172   :  { %5068 = vmatpush3.msra.mxu1 %v6300_v6  ;;  %5023 = vmatprep.subr.mxu0 %v8102_v60  ;;  %v8105_v6 = vld [vmem:[#allocation8_spill] sm:$0xff] }
 0x173   :  { %5069 = vmatprep.subr.mxu1 %v6302_v8  ;;  %5024 = vmatpush3.msra.mxu0 %v8102_v60  ;;  %v3994_v60 = vld [vmem:[%s7920_s1 + $0x128] sm:$0xff] }
 0x174   :  { %5070 = vmatpush3.msra.mxu1 %v6302_v8  ;;  %5025 = vmatprep.subr.mxu0 %v8103_v62  ;;  %v8106_v8 = vld [vmem:[#allocation9_spill] sm:$0xff] }
 0x175   :  { %5071 = vmatprep.subr.mxu1 %v6348_v41  ;;  %5026 = vmatpush3.msra.mxu0 %v8103_v62  ;;  %v1787_v62 = vsub.f32 %v6765_v9, %v6775_v10 }
 0x176   :  { %5072 = vmatpush3.msra.mxu1 %v6348_v41  ;;  %5027 = vmatprep.subr.mxu0 %v8104_v1  ;;  %v8111_v41 = vld [vmem:[#allocation16_spill] sm:$0xff] }
 0x177   :  { %5073 = vmatprep.subr.mxu1 %v6360_v50  ;;  %5028 = vmatpush3.msra.mxu0 %v8104_v1  ;;  %v6790_v1 = vand.u32 4294901760, %v6778_v24 }
 0x178   :  { %5074 = vmatpush3.msra.mxu1 %v6360_v50  ;;  %5029 = vmatprep.subr.mxu0 %v8105_v6  ;;  %v8113_v50 = vld [vmem:[#allocation19_spill] sm:$0xff] }
 0x179   :  { %5075 = vmatprep.subr.mxu1 %v6373_v48  ;;  %5030 = vmatpush3.msra.mxu0 %v8105_v6  ;;  %8123 = vst [vmem:[#allocation6_spill] sm:$0xff] %v6790_v1  ;;  %v6793_v6 = vsub.f32 %v3995_v34, %v6780_v39 }
 0x17a   :  { %5076 = vmatpush3.msra.mxu1 %v6373_v48  ;;  %5031 = vmatprep.subr.mxu0 %v8106_v8  ;;  %v4004_v48 = vld [vmem:[%s7920_s1 + $0x178] sm:$0xff] }
 0x17b   :  { %5077 = vmatprep.subr.mxu1 %v6388_v53  ;;  %5032 = vmatpush3.msra.mxu0 %v8106_v8  ;;  %v6654_v46 = vand.u32 4294901760, %v4004_v48  ;;  %v6795_v8 = vand.u32 4294901760, %v3994_v60 }
 0x17c   :  { %5078 = vmatpush3.msra.mxu1 %v6388_v53  ;;  %5033 = vmatprep.subr.mxu0 %v8107_v31  ;;  %v4003_v53 = vld [vmem:[%s7920_s1 + $0x170] sm:$0xff] }
 0x17d   :  { %5079 = vmatprep.subr.mxu1 %v6404_v26  ;;  %5034 = vmatpush3.msra.mxu0 %v8107_v31  ;;  %v6660_v11 = vsub.f32 %v4004_v48, %v6654_v46  ;;  %v3993_v31 = vld [vmem:[%s7920_s1 + $0x120] sm:$0xff] }
 0x17e   :  { %5080 = vmatpush3.msra.mxu1 %v6404_v26  ;;  %5035 = vmatprep.subr.mxu0 %v8108_v32  ;;  %v6662_v26 = vand.u32 4294901760, %v4003_v53 }
 0x17f   :  { %5081 = vmatprep.subr.mxu1 %v6415_v52  ;;  %5036 = vmatpush3.msra.mxu0 %v8108_v32  ;;  %v1788_v32 = vand.u32 4294901760, %v1787_v62 }
 0x180   :  { %5082 = vmatpush3.msra.mxu1 %v6415_v52  ;;  %5037 = vmatprep.subr.mxu0 %v8109_v37  ;;  %v4002_v52 = vld [vmem:[%s7920_s1 + $0x168] sm:$0xff] }
 0x181   :  { %5083 = vmatprep.subr.mxu1 %v6430_v49  ;;  %5038 = vmatpush3.msra.mxu0 %v8109_v37  ;;  %v6675_v20 = vand.u32 4294901760, %v4002_v52  ;;  %v1794_v37 = vsub.f32 %v6778_v24, %v6790_v1 }
 0x182   :  { %5084 = vmatpush3.msra.mxu1 %v6430_v49  ;;  %5039 = vmatprep.subr.mxu0 %v8110_v38  ;;  %v6670_v49 = vand.u32 4294901760, %v6660_v11 }
 0x183   :  { %5085 = vmatprep.subr.mxu1 %v6446_v44  ;;  %5040 = vmatpush3.msra.mxu0 %v8110_v38  ;;  %v6805_v38 = vand.u32 4294901760, %v6793_v6 }
 0x184   :  { %5086 = vmatpush3.msra.mxu1 %v6446_v44  ;;  %5041 = vmatprep.subr.mxu0 %v8111_v41  ;;  %8115 = vst [vmem:[#allocation14_spill] sm:$0xff] %v6670_v49  ;;  %v6673_v44 = vsub.f32 %v4003_v53, %v6662_v26  ;;  %v1738_v45 = vsub.f32 %v6660_v11, %v6670_v49 }
 0x185   :  { %5088 = vmatmul.mubr.f32.vlgmr.msra.gmra.mxu1 %v6474_v61  ;;  %5042 = vmatpush3.msra.mxu0 %v8111_v41  ;;  %8124 = vst [vmem:[#allocation7_spill] sm:$0xff] %v6805_v38  ;;  %v6808_v41 = vsub.f32 %v3994_v60, %v6795_v8  ;;  %v1801_v48 = vsub.f32 %v6793_v6, %v6805_v38 }
 0x186   :  { %5090 = vmatprep.mubr.f32.mxu1 %v6490_v2  ;;  %5043 = vmatprep.subr.mxu0 %v8112_v0  ;;  %v6700_v35 = vand.u32 4294901760, %v6673_v44  ;;  %v1739_v43 = vand.u32 4294901760, %v1738_v45 }
 0x187   :  { %5044 = vmatpush3.msra.mxu0 %v8112_v0  ;;  %v6811_v0 = vand.u32 4294901760, %v3993_v31  ;;  %v6820_v53 = vand.u32 4294901760, %v6808_v41  ;;  %v1802_v3 = vand.u32 4294901760, %v1801_v48 }
 0x188   :  { %5045 = vmatprep.subr.mxu0 %v8113_v50  ;;  %8116 = vst [vmem:[#allocation15_spill] sm:$0xff] %v6700_v35  ;;  %v1745_v51 = vsub.f32 %v6673_v44, %v6700_v35  ;;  %5131 = vmatprep.subr.mxu1 %v1739_v43 }
 0x189   :  { %5091 = vmatmul.mubr.f32.gmra.mxu1 %v6483_v28  ;;  %5046 = vmatpush3.msra.mxu0 %v8113_v50  ;;  %v3992_v50 = vld [vmem:[%s7920_s1 + $0x118] sm:$0xff]  ;;  %8125 = vst [vmem:[#allocation8_spill] sm:$0xff] %v6820_v53  ;;  %v6825_v22 = vsub.f32 %v3993_v31, %v6811_v0  ;;  %v1808_v25 = vsub.f32 %v6808_v41, %v6820_v53 }
 0x18a   :  { %5047 = vmatprep.subr.mxu0 %v8114_v19  ;;  %v1746_v59 = vand.u32 4294901760, %v1745_v51  ;;  %5132 = vmatpush3.msra.mxu1 %v1739_v43  ;;  %v6836_v43 = vand.u32 4294901760, %v3991_v21 }
 0x18b   :  { %5048 = vmatpush3.msra.mxu0 %v8114_v19  ;;  %v1795_v19 = vand.u32 4294901760, %v1794_v37  ;;  %v6840_v51 = vand.u32 4294901760, %v6825_v22 }
 0x18c   :  { %5050 = vmatmul.mubr.f32.vlgmr.msra.gmra.mxu0 %v6474_v61  ;;  %5093 = vmatprep.subr.mxu0 %v6654_v46  ;;  %v6703_v61 = vsub.f32 %v4002_v52, %v6675_v20  ;;  %v6822_v52 = vand.u32 4294901760, %v3992_v50 }
 0x18d   :  { %5052 = vmatprep.mubr.f32.mxu0 %v6490_v2  ;;  %5094 = vmatpush3.msra.mxu0 %v6654_v46  ;;  %8126 = vst [vmem:[#allocation9_spill] sm:$0xff] %v6840_v51  ;;  %v1815_v63 = vsub.f32 %v6825_v22, %v6840_v51 }
 0x18e   :  { %5095 = vmatprep.subr.mxu0 %v6662_v26  ;;  %v6721_v58 = vand.u32 4294901760, %v6703_v61  ;;  %5133 = vmatprep.subr.mxu1 %v1746_v59  ;;  %v6834_v45 = vsub.f32 %v3992_v50, %v6822_v52 }
 0x18f   :  { %5096 = vmatpush3.msra.mxu0 %v6662_v26  ;;  %5134 = vmatpush3.msra.mxu1 %v1746_v59  ;;  %v3990_v59 = vld [vmem:[%s7920_s1 + $0x108] sm:$0xff] }
 0x190   :  { %5053 = vmatmul.mubr.f32.gmra.mxu0 %v6483_v28  ;;  %5097 = vmatprep.subr.mxu0 %v6675_v20  ;;  %8117 = vst [vmem:[#allocation18_spill] sm:$0xff] %v6721_v58  ;;  %v6731_v28 = vand.u32 4294901760, %v6712_v47  ;;  %v1752_v2 = vsub.f32 %v6703_v61, %v6721_v58  ;;  %v6847_v57 = vand.u32 4294901760, %v6834_v45 }
 0x191   :  { %5098 = vmatpush3.msra.mxu0 %v6675_v20 }
 0x192   :  { %5099 = vmatprep.subr.mxu0 %v6687_v27  ;;  %8119 = vst [vmem:[#allocation2_spill] sm:$0xff] %v6731_v28  ;;  %v1766_v40 = vsub.f32 %v6712_v47, %v6731_v28  ;;  %v1753_v36 = vand.u32 4294901760, %v1752_v2  ;;  %v1809_v2 = vand.u32 4294901760, %v1808_v25  ;;  %8127 = vst [vmem:[#allocation10_spill] sm:$0xff] %v6847_v57  ;;  %v1822_v33 = vsub.f32 %v6834_v45, %v6847_v57 }
 0x193   :  { %5100 = vmatpush3.msra.mxu0 %v6687_v27 }
 0x194   :  { %5101 = vmatprep.subr.mxu0 %v6689_v13  ;;  %5135 = vmatprep.subr.mxu1 %v1753_v36  ;;  %v1767_v18 = vand.u32 4294901760, %v1766_v40  ;;  %v6850_v40 = vsub.f32 %v3991_v21, %v6836_v43  ;;  %v1823_v34 = vand.u32 4294901760, %v1822_v33 }
 0x195   :  { %5102 = vmatpush3.msra.mxu0 %v6689_v13  ;;  %5136 = vmatpush3.msra.mxu1 %v1753_v36  ;;  %v6852_v36 = vand.u32 4294901760, %v3990_v59 }
 0x196   :  { %5103 = vmatprep.subr.mxu0 %v6691_v42  ;;  %5137 = vmatprep.subr.mxu1 %v1760_v14 }
 0x197   :  { %5104 = vmatpush3.msra.mxu0 %v6691_v42  ;;  %5138 = vmatpush3.msra.mxu1 %v1760_v14  ;;  %v3989_v14 = vld [vmem:[%s7920_s1 + $0x100] sm:$0xff]  ;;  %v6867_v55 = vsub.f32 %v3990_v59, %v6852_v36 }
 0x198   :  { %5105 = vmatprep.subr.mxu0 %v6706_v7  ;;  %5139 = vmatprep.subr.mxu1 %v1767_v18  ;;  %v6869_v15 = vand.u32 4294901760, %v3989_v14 }
 0x199   :  { %5106 = vmatpush3.msra.mxu0 %v6706_v7  ;;  %5140 = vmatpush3.msra.mxu1 %v1767_v18  ;;  %v6864_v18 = vand.u32 4294901760, %v6850_v40  ;;  %8129 = vst [vmem:[#allocation12_spill] sm:$0xff] %v6867_v55  ;;  %v6876_v60 = vand.u32 4294901760, %v6867_v55 }
 0x19a   :  { %5107 = vmatprep.subr.mxu0 %v6757_v54  ;;  %5141 = vmatprep.subr.mxu1 %v1774_v29  ;;  %v6879_v62 = vsub.f32 %v3989_v14, %v6869_v15 }
 0x19b   :  { %5108 = vmatpush3.msra.mxu0 %v6757_v54  ;;  %5142 = vmatpush3.msra.mxu1 %v1774_v29  ;;  %8128 = vst [vmem:[#allocation11_spill] sm:$0xff] %v6864_v18  ;;  %v1816_v29 = vand.u32 4294901760, %v1815_v63  ;;  %8130 = vst [vmem:[#allocation13_spill] sm:$0xff] %v6876_v60 }
 0x19c   :  { %5109 = vmatprep.subr.mxu0 %v6767_v23  ;;  %5143 = vmatprep.subr.mxu1 %v1781_v4  ;;  %8131 = vst [vmem:[#allocation16_spill] sm:$0xff] %v6879_v62  ;;  %v6886_v37 = vand.u32 4294901760, %v6879_v62 }
 0x19d   :  { %5110 = vmatpush3.msra.mxu0 %v6767_v23  ;;  %5144 = vmatpush3.msra.mxu1 %v1781_v4  ;;  %v1829_v4 = vsub.f32 %v6850_v40, %v6864_v18 }
 0x19e   :  { %5111 = vmatprep.subr.mxu0 %v6780_v39  ;;  %5145 = vmatprep.subr.mxu1 %v1788_v32  ;;  %8132 = vst [vmem:[#allocation17_spill] sm:$0xff] %v6886_v37 }
 0x19f   :  { %5112 = vmatpush3.msra.mxu0 %v6780_v39  ;;  %5146 = vmatpush3.msra.mxu1 %v1788_v32  ;;  %v1830_v31 = vand.u32 4294901760, %v1829_v4  ;;  %v1836_v32 = vsub.f32 %v6867_v55, %v6876_v60 }
 0x1a0   :  { %5113 = vmatprep.subr.mxu0 %v6795_v8  ;;  %5147 = vmatprep.subr.mxu1 %v1795_v19 }
 0x1a1   :  { %5114 = vmatpush3.msra.mxu0 %v6795_v8  ;;  %5148 = vmatpush3.msra.mxu1 %v1795_v19  ;;  %v1837_v50 = vand.u32 4294901760, %v1836_v32  ;;  %v1843_v19 = vsub.f32 %v6879_v62, %v6886_v37 }
 0x1a2   :  { %5115 = vmatprep.subr.mxu0 %v6811_v0  ;;  %5149 = vmatprep.subr.mxu1 %v1802_v3 }
 0x1a3   :  { %5116 = vmatpush3.msra.mxu0 %v6811_v0  ;;  %5150 = vmatpush3.msra.mxu1 %v1802_v3  ;;  %v1844_v48 = vand.u32 4294901760, %v1843_v19 }
 0x1a4   :  { %5117 = vmatprep.subr.mxu0 %v6822_v52  ;;  %5151 = vmatprep.subr.mxu1 %v1809_v2 }
 0x1a5   :  { %5118 = vmatpush3.msra.mxu0 %v6822_v52  ;;  %5152 = vmatpush3.msra.mxu1 %v1809_v2 }
 0x1a6   :  { %5119 = vmatprep.subr.mxu0 %v6836_v43  ;;  %5153 = vmatprep.subr.mxu1 %v1816_v29 }
 0x1a7   :  { %5120 = vmatpush3.msra.mxu0 %v6836_v43  ;;  %5154 = vmatpush3.msra.mxu1 %v1816_v29 }
 0x1a8   :  { %5121 = vmatprep.subr.mxu0 %v6852_v36  ;;  %5155 = vmatprep.subr.mxu1 %v1823_v34 }
 0x1a9   :  { %5122 = vmatpush3.msra.mxu0 %v6852_v36  ;;  %5156 = vmatpush3.msra.mxu1 %v1823_v34 }
 0x1aa   :  { %5123 = vmatprep.subr.mxu0 %v6869_v15  ;;  %5157 = vmatprep.subr.mxu1 %v1830_v31 }
 0x1ab   :  { %5124 = vmatpush3.msra.mxu0 %v6869_v15  ;;  %5158 = vmatpush3.msra.mxu1 %v1830_v31 }
 0x1ac   :  { %5169 = vmatprep.subr.mxu0 %v6660_v11  ;;  %5159 = vmatprep.subr.mxu1 %v1837_v50 }
 0x1ad   :  { %5160 = vmatpush3.msra.mxu1 %v1837_v50 }
 0x1ae   :  { %5161 = vmatprep.subr.mxu1 %v1844_v48 }
 0x1af   :  { %5162 = vmatpush3.msra.mxu1 %v1844_v48 }
 0x1b0   :  { %5207 = vmatprep.subr.mxu1 %v6654_v46 }
 0x1ff   :  { %v4937_v21 = vpop.f32.mrf.mxu1 }
 0x201   :  { %v1090_v3 = vpop.f32.mrf.mxu1 }
 0x203   :  { %v4940_v59 = vpop.f32.mrf.mxu1 }
 0x205   :  { %v1102_v63 = vpop.f32.mrf.mxu1 }
 0x207   :  { %v4899_v25 = vpop.f32.mrf.mxu0 }
 0x208   :  { %v1097_v19 = vadd.f32 %v4937_v21, %v4899_v25 }
 0x209   :  { %v909_v2 = vpop.f32.mrf.mxu0 }
 0x20a   :  { %v1091_v60 = vadd.f32 %v1090_v3, %v909_v2 }
 0x20c   :  { %v4902_v14 = vpop.f32.mrf.mxu0 }
 0x20d   :  { %v1109_v57 = vadd.f32 %v4940_v59, %v4902_v14 }
 0x20e   :  { %v929_v29 = vpop.f32.mrf.mxu0 }
 0x20f   :  { %v1103_v38 = vadd.f32 %v1102_v63, %v929_v29 }
 0x221   :  { %v5013_v33 = vpop.f32.mrf.mxu1 }
 0x223   :  { %v1322_v34 = vpop.f32.mrf.mxu1 }
 0x226   :  { %v5016_v32 = vpop.f32.mrf.mxu1 }
 0x228   :  { %v1338_v37 = vpop.f32.mrf.mxu1 }
 0x22a   :  { %v4975_v4 = vpop.f32.mrf.mxu0 }
 0x22b   :  { %v1220_v48 = vadd.f32 %v4975_v4, %v1097_v19 }
 0x22c   :  { %v1212_v31 = vpop.f32.mrf.mxu0 }
 0x22d   :  { %v1213_v51 = vadd.f32 %v1212_v31, %v1091_v60  ;;  %v1331_v10 = vadd.f32 %v5013_v33, %v1220_v48 }
 0x22f   :  { %v4978_v50 = vpop.f32.mrf.mxu0  ;;  %v1323_v58 = vadd.f32 %v1322_v34, %v1213_v51 }
 0x230   :  { %v1234_v1 = vadd.f32 %v4978_v50, %v1109_v57 }
 0x231   :  { %v1226_v53 = vpop.f32.mrf.mxu0 }
 0x232   :  { %v1227_v28 = vadd.f32 %v1226_v53, %v1103_v38  ;;  %v1347_v21 = vadd.f32 %v5016_v32, %v1234_v1 }
 0x234   :  { %v1339_v59 = vadd.f32 %v1338_v37, %v1227_v28 }
 0x245   :  { %v5089_v18 = vpop.f32.mrf.mxu1 }
 0x247   :  { %v1570_v5 = vpop.f32.mrf.mxu1 }
 0x249   :  { %v5092_v25 = vpop.f32.mrf.mxu1 }
 0x24b   :  { %v1582_v29 = vpop.f32.mrf.mxu1 }
 0x24c   :  { %v5051_v56 = vpop.f32.mrf.mxu0 }
 0x24d   :  { %v1472_v16 = vadd.f32 %v5051_v56, %v1331_v10 }
 0x24e   :  { %v1465_v35 = vpop.f32.mrf.mxu0 }
 0x24f   :  { %v1577_v49 = vadd.f32 %v5089_v18, %v1472_v16  ;;  %v1466_v62 = vadd.f32 %v1465_v35, %v1323_v58 }
 0x250   :  { %v5054_v55 = vpop.f32.mrf.mxu0 }
 0x251   :  { %v1593_v3 = vmax.f32 %v1577_v49, 0.0  ;;  %v1571_v2 = vadd.f32 %v1570_v5, %v1466_v62  ;;  %v1484_v4 = vadd.f32 %v5054_v55, %v1347_v21 }
 0x252   :  { %v1477_v60 = vpop.f32.mrf.mxu0 }
 0x253   :  { %v6893_v14 = vand.u32 4294901760, %v1593_v3  ;;  %v1592_v57 = vmax.f32 %v1571_v2, 0.0  ;;  %v1589_v63 = vadd.f32 %v5092_v25, %v1484_v4  ;;  %v1478_v33 = vadd.f32 %v1477_v60, %v1339_v59  ;;  %v4014_v2 = vld [vmem:[%s7920_s1 + $0x1c8] sm:$0xff] }
 0x255   :  { %v6896_v56 = vsub.f32 %v1593_v3, %v6893_v14  ;;  %v6898_v10 = vand.u32 4294901760, %v1592_v57  ;;  %v1595_v35 = vmax.f32 %v1589_v63, 0.0  ;;  %v1583_v58 = vadd.f32 %v1582_v29, %v1478_v33 }
 0x257   :  { %v1706_v16 = vand.u32 4294901760, %v6896_v56  ;;  %v1695_v49 = vsub.f32 %v1592_v57, %v6898_v10  ;;  %v6902_v5 = vand.u32 4294901760, %v1595_v35  ;;  %v1594_v28 = vmax.f32 %v1583_v58, 0.0  ;;  %5163 = vmatprep.mubr.f32.mxu1 %v6898_v10 }
 0x258   :  { %5164 = vmatmul.mubr.f32.vlgmr.msra.gmra.mxu1 %v6893_v14 }
 0x259   :  { %v6907_v1 = vsub.f32 %v1595_v35, %v6902_v5  ;;  %v6909_v38 = vand.u32 4294901760, %v1594_v28  ;;  %5208 = vmatpush3.msra.mxu1 %v6654_v46  ;;  %v1696_v53 = vand.u32 4294901760, %v1695_v49  ;;  %v1707_v51 = vsub.f32 %v6896_v56, %v1706_v16 }
 0x25a   :  { %5209 = vmatprep.subr.mxu1 %v6662_v26 }
 0x25b   :  { %v6917_v18 = vsub.f32 %v1594_v28, %v6909_v38  ;;  %5210 = vmatpush3.msra.mxu1 %v6662_v26  ;;  %5166 = vmatprep.mubr.f32.mxu1 %v6909_v38  ;;  %v1697_v55 = vsub.f32 %v1695_v49, %v1696_v53  ;;  %v1726_v62 = vand.u32 4294901760, %v6907_v1  ;;  %v1708_v32 = vand.u32 4294901760, %v1707_v51 }
 0x25c   :  { %5211 = vmatprep.subr.mxu1 %v6675_v20  ;;  %5167 = vmatmul.mubr.f32.gmra.mxu1 %v6902_v5 }
 0x25d   :  { %5212 = vmatpush3.msra.mxu1 %v6675_v20  ;;  %5239 = vmatprep.mubr.f32.mxu1 %v1696_v53  ;;  %v1698_v37 = vand.u32 4294901760, %v1697_v55  ;;  %v1716_v34 = vand.u32 4294901760, %v6917_v18  ;;  %v1727_v19 = vsub.f32 %v6907_v1, %v1726_v62 }
 0x25e   :  { %5213 = vmatprep.subr.mxu1 %v6687_v27 }
 0x25f   :  { %5214 = vmatpush3.msra.mxu1 %v6687_v27  ;;  %5125 = vmatprep.mubr.f32.mxu0 %v1698_v37  ;;  %v1717_v31 = vsub.f32 %v6917_v18, %v1716_v34  ;;  %v1728_v48 = vand.u32 4294901760, %v1727_v19 }
 0x260   :  { %5215 = vmatprep.subr.mxu1 %v6689_v13  ;;  %5126 = vmatmul.mubr.f32.vlgmr.msra.gmra.mxu0 %v1708_v32 }
 0x261   :  { %5170 = vmatpush3.msra.mxu0 %v6660_v11  ;;  %5216 = vmatpush3.msra.mxu1 %v6689_v13  ;;  %v1718_v50 = vand.u32 4294901760, %v1717_v31  ;;  %v8133_v11 = vld [vmem:[#allocation12_spill] sm:$0xff]  ;;  %v4012_v31 = vld [vmem:[%s7920_s1 + $0x1b8] sm:$0xff] }
 0x262   :  { %5171 = vmatprep.subr.mxu0 %v6673_v44  ;;  %5217 = vmatprep.subr.mxu1 %v6691_v42 }
 0x263   :  { %5172 = vmatpush3.msra.mxu0 %v6673_v44  ;;  %5218 = vmatpush3.msra.mxu1 %v6691_v42  ;;  %v8136_v44 = vld [vmem:[#allocation15_spill] sm:$0xff] }
 0x264   :  { %5128 = vmatprep.mubr.f32.mxu0 %v1718_v50  ;;  %5173 = vmatprep.subr.mxu0 %v6703_v61 }
 0x265   :  { %5219 = vmatprep.subr.mxu1 %v6706_v7  ;;  %5129 = vmatmul.mubr.f32.gmra.mxu0 %v1728_v48  ;;  %v7186_v48 = vand.u32 4294901760, %v4012_v31 }
 0x266   :  { %5174 = vmatpush3.msra.mxu0 %v6703_v61  ;;  %5220 = vmatpush3.msra.mxu1 %v6706_v7  ;;  %v8141_v61 = vld [vmem:[#allocation4_spill] sm:$0xff] }
 0x267   :  { %5175 = vmatprep.subr.mxu0 %v6709_v12  ;;  %5201 = vmatprep.mubr.f32.mxu0 %v1695_v49 }
 0x268   :  { %5221 = vmatprep.subr.mxu1 %v6757_v54  ;;  %5176 = vmatpush3.msra.mxu0 %v6709_v12  ;;  %v8143_v12 = vld [vmem:[#allocation6_spill] sm:$0xff] }
 0x269   :  { %5222 = vmatpush3.msra.mxu1 %v6757_v54  ;;  %5177 = vmatprep.subr.mxu0 %v6712_v47 }
 0x26a   :  { %5223 = vmatprep.subr.mxu1 %v6767_v23  ;;  %5178 = vmatpush3.msra.mxu0 %v6712_v47  ;;  %v8144_v47 = vld [vmem:[#allocation7_spill] sm:$0xff] }
 0x26b   :  { %5224 = vmatpush3.msra.mxu1 %v6767_v23  ;;  %5179 = vmatprep.subr.mxu0 %v6715_v17 }
 0x26c   :  { %5225 = vmatprep.subr.mxu1 %v6780_v39  ;;  %5180 = vmatpush3.msra.mxu0 %v6715_v17  ;;  %v8145_v17 = vld [vmem:[#allocation8_spill] sm:$0xff] }
 0x26d   :  { %5226 = vmatpush3.msra.mxu1 %v6780_v39  ;;  %5181 = vmatprep.subr.mxu0 %v6724_v30 }
 0x26e   :  { %5227 = vmatprep.subr.mxu1 %v6795_v8  ;;  %5182 = vmatpush3.msra.mxu0 %v6724_v30  ;;  %v8146_v30 = vld [vmem:[#allocation9_spill] sm:$0xff] }
 0x26f   :  { %5228 = vmatpush3.msra.mxu1 %v6795_v8  ;;  %5183 = vmatprep.subr.mxu0 %v6765_v9 }
 0x270   :  { %5229 = vmatprep.subr.mxu1 %v6811_v0  ;;  %5184 = vmatpush3.msra.mxu0 %v6765_v9  ;;  %v8148_v9 = vld [vmem:[#allocation11_spill] sm:$0xff] }
 0x271   :  { %5230 = vmatpush3.msra.mxu1 %v6811_v0  ;;  %5185 = vmatprep.subr.mxu0 %v6778_v24 }
 0x272   :  { %5231 = vmatprep.subr.mxu1 %v6822_v52  ;;  %5186 = vmatpush3.msra.mxu0 %v6778_v24  ;;  %v8150_v24 = vld [vmem:[#allocation17_spill] sm:$0xff] }
 0x273   :  { %5232 = vmatpush3.msra.mxu1 %v6822_v52  ;;  %5187 = vmatprep.subr.mxu0 %v6793_v6 }
 0x274   :  { %5233 = vmatprep.subr.mxu1 %v6836_v43  ;;  %5188 = vmatpush3.msra.mxu0 %v6793_v6 }
 0x275   :  { %5234 = vmatpush3.msra.mxu1 %v6836_v43  ;;  %5189 = vmatprep.subr.mxu0 %v6808_v41 }
 0x276   :  { %5235 = vmatprep.subr.mxu1 %v6852_v36  ;;  %5190 = vmatpush3.msra.mxu0 %v6808_v41 }
 0x277   :  { %5236 = vmatpush3.msra.mxu1 %v6852_v36  ;;  %5191 = vmatprep.subr.mxu0 %v6825_v22 }
 0x278   :  { %5237 = vmatprep.subr.mxu1 %v6869_v15  ;;  %5192 = vmatpush3.msra.mxu0 %v6825_v22 }
 0x279   :  { %5238 = vmatpush3.msra.mxu1 %v6869_v15  ;;  %5193 = vmatprep.subr.mxu0 %v6834_v45 }
 0x27a   :  { %5240 = vmatmul.mubr.f32.vlgmr.msra.gmra.mxu1 %v1706_v16  ;;  %5283 = vmatprep.subr.mxu1 %v6654_v46 }
 0x27b   :  { %5194 = vmatpush3.msra.mxu0 %v6834_v45  ;;  %5242 = vmatprep.mubr.f32.mxu1 %v1716_v34 }
 0x27c   :  { %5284 = vmatpush3.msra.mxu1 %v6654_v46  ;;  %5195 = vmatprep.subr.mxu0 %v6850_v40  ;;  %v8134_v46 = vld [vmem:[#allocation16_spill] sm:$0xff] }
 0x27d   :  { %5285 = vmatprep.subr.mxu1 %v6662_v26  ;;  %5196 = vmatpush3.msra.mxu0 %v6850_v40  ;;  %v4017_v40 = vld [vmem:[%s7920_s1 + $0x1e0] sm:$0xff] }
 0x27e   :  { %5286 = vmatpush3.msra.mxu1 %v6662_v26  ;;  %5197 = vmatprep.subr.mxu0 %v8133_v11  ;;  %v8135_v26 = vld [vmem:[#allocation14_spill] sm:$0xff]  ;;  %v7106_v21 = vand.u32 4294901760, %v4017_v40 }
 0x27f   :  { %5243 = vmatmul.mubr.f32.gmra.mxu1 %v1726_v62  ;;  %5287 = vmatprep.subr.mxu1 %v6675_v20  ;;  %v4013_v62 = vld [vmem:[%s7920_s1 + $0x1c0] sm:$0xff] }
 0x280   :  { %5198 = vmatpush3.msra.mxu0 %v8133_v11  ;;  %5288 = vmatpush3.msra.mxu1 %v6675_v20  ;;  %v8137_v20 = vld [vmem:[#allocation18_spill] sm:$0xff]  ;;  %v7128_v57 = vsub.f32 %v4017_v40, %v7106_v21  ;;  %v7176_v32 = vand.u32 4294901760, %v4013_v62  ;;  %v4011_v11 = vld [vmem:[%s7920_s1 + $0x1b0] sm:$0xff] }
 0x281   :  { %5315 = vmatprep.mubr.f32.mxu1 %v6898_v10  ;;  %5199 = vmatprep.subr.mxu0 %v8134_v46 }
 0x282   :  { %5289 = vmatprep.subr.mxu1 %v6687_v27  ;;  %5200 = vmatpush3.msra.mxu0 %v8134_v46  ;;  %v7147_v58 = vand.u32 4294901760, %v7128_v57  ;;  %v7184_v50 = vsub.f32 %v4013_v62, %v7176_v32 }
 0x283   :  { %5290 = vmatpush3.msra.mxu1 %v6687_v27  ;;  %5202 = vmatmul.mubr.f32.vlgmr.msra.gmra.mxu0 %v6896_v56  ;;  %v8138_v27 = vld [vmem:[#allocation20_spill] sm:$0xff] }
 0x284   :  { %5245 = vmatprep.subr.mxu0 %v8135_v26  ;;  %5291 = vmatprep.subr.mxu1 %v6689_v13  ;;  %8154 = vst [vmem:[#allocation16_spill] sm:$0xff] %v7147_v58 }
 0x285   :  { %5204 = vmatprep.mubr.f32.mxu0 %v6917_v18  ;;  %5246 = vmatpush3.msra.mxu0 %v8135_v26  ;;  %v7194_v26 = vand.u32 4294901760, %v7184_v50 }
 0x286   :  { %5292 = vmatpush3.msra.mxu1 %v6689_v13  ;;  %5247 = vmatprep.subr.mxu0 %v8136_v44  ;;  %v8139_v13 = vld [vmem:[#allocation2_spill] sm:$0xff] }
 0x287   :  { %5293 = vmatprep.subr.mxu1 %v6691_v42  ;;  %5248 = vmatpush3.msra.mxu0 %v8136_v44  ;;  %8158 = vst [vmem:[#allocation20_spill] sm:$0xff] %v7194_v26  ;;  %v7197_v44 = vsub.f32 %v4012_v31, %v7186_v48 }
 0x288   :  { %5294 = vmatpush3.msra.mxu1 %v6691_v42  ;;  %5205 = vmatmul.mubr.f32.gmra.mxu0 %v6907_v1  ;;  %v8140_v42 = vld [vmem:[#allocation3_spill] sm:$0xff] }
 0x289   :  { %5249 = vmatprep.subr.mxu0 %v8137_v20  ;;  %5295 = vmatprep.subr.mxu1 %v6706_v7 }
 0x28a   :  { %5250 = vmatpush3.msra.mxu0 %v8137_v20  ;;  %5277 = vmatprep.mubr.f32.mxu0 %v6898_v10  ;;  %v7199_v20 = vand.u32 4294901760, %v4011_v11 }
 0x28b   :  { %5296 = vmatpush3.msra.mxu1 %v6706_v7  ;;  %5251 = vmatprep.subr.mxu0 %v8138_v27  ;;  %v8142_v7 = vld [vmem:[#allocation5_spill] sm:$0xff] }
 0x28c   :  { %5297 = vmatprep.subr.mxu1 %v6757_v54  ;;  %5252 = vmatpush3.msra.mxu0 %v8138_v27  ;;  %v4010_v27 = vld [vmem:[%s7920_s1 + $0x1a8] sm:$0xff] }
 0x28d   :  { %5298 = vmatpush3.msra.mxu1 %v6757_v54  ;;  %5253 = vmatprep.subr.mxu0 %v8139_v13  ;;  %v8147_v54 = vld [vmem:[#allocation10_spill] sm:$0xff] }
 0x28e   :  { %5299 = vmatprep.subr.mxu1 %v6767_v23  ;;  %5254 = vmatpush3.msra.mxu0 %v8139_v13  ;;  %v2578_v13 = vsub.f32 %v7184_v50, %v7194_v26 }
 0x28f   :  { %5300 = vmatpush3.msra.mxu1 %v6767_v23  ;;  %5255 = vmatprep.subr.mxu0 %v8140_v42  ;;  %v8149_v23 = vld [vmem:[#allocation13_spill] sm:$0xff] }
 0x290   :  { %5301 = vmatprep.subr.mxu1 %v6780_v39  ;;  %5256 = vmatpush3.msra.mxu0 %v8140_v42  ;;  %v7209_v42 = vand.u32 4294901760, %v7197_v44 }
 0x291   :  { %5302 = vmatpush3.msra.mxu1 %v6780_v39  ;;  %5257 = vmatprep.subr.mxu0 %v8141_v61  ;;  %v4020_v39 = vld [vmem:[%s7920_s1 + $0x1f8] sm:$0xff] }
 0x292   :  { %5303 = vmatprep.subr.mxu1 %v6795_v8  ;;  %5258 = vmatpush3.msra.mxu0 %v8141_v61  ;;  %v7073_v6 = vand.u32 4294901760, %v4020_v39  ;;  %8159 = vst [vmem:[#allocation2_spill] sm:$0xff] %v7209_v42  ;;  %v7212_v61 = vsub.f32 %v4011_v11, %v7199_v20 }
 0x293   :  { %5304 = vmatpush3.msra.mxu1 %v6795_v8  ;;  %5259 = vmatprep.subr.mxu0 %v8142_v7  ;;  %v4019_v8 = vld [vmem:[%s7920_s1 + $0x1f0] sm:$0xff] }
 0x294   :  { %5305 = vmatprep.subr.mxu1 %v6811_v0  ;;  %5260 = vmatpush3.msra.mxu0 %v8142_v7  ;;  %v7079_v41 = vsub.f32 %v4020_v39, %v7073_v6  ;;  %v7214_v7 = vand.u32 4294901760, %v4010_v27 }
 0x295   :  { %5306 = vmatpush3.msra.mxu1 %v6811_v0  ;;  %5261 = vmatprep.subr.mxu0 %v8143_v12  ;;  %v7081_v0 = vand.u32 4294901760, %v4019_v8 }
 0x296   :  { %5307 = vmatprep.subr.mxu1 %v6822_v52  ;;  %5262 = vmatpush3.msra.mxu0 %v8143_v12  ;;  %v7089_v22 = vand.u32 4294901760, %v7079_v41  ;;  %v4009_v12 = vld [vmem:[%s7920_s1 + $0x1a0] sm:$0xff] }
 0x297   :  { %5308 = vmatpush3.msra.mxu1 %v6822_v52  ;;  %5263 = vmatprep.subr.mxu0 %v8144_v47  ;;  %v4018_v52 = vld [vmem:[%s7920_s1 + $0x1e8] sm:$0xff]  ;;  %v7092_v45 = vsub.f32 %v4019_v8, %v7081_v0 }
 0x298   :  { %5309 = vmatprep.subr.mxu1 %v6836_v43  ;;  %5264 = vmatpush3.msra.mxu0 %v8144_v47  ;;  %8151 = vst [vmem:[#allocation19_spill] sm:$0xff] %v7089_v22  ;;  %v2529_v4 = vsub.f32 %v7079_v41, %v7089_v22  ;;  %v2579_v47 = vand.u32 4294901760, %v2578_v13 }
 0x299   :  { %5310 = vmatpush3.msra.mxu1 %v6836_v43  ;;  %5265 = vmatprep.subr.mxu0 %v8145_v17  ;;  %v7094_v43 = vand.u32 4294901760, %v4018_v52  ;;  %v7119_v59 = vand.u32 4294901760, %v7092_v45 }
 0x29a   :  { %5311 = vmatprep.subr.mxu1 %v6852_v36  ;;  %5266 = vmatpush3.msra.mxu0 %v8145_v17  ;;  %v2530_v29 = vand.u32 4294901760, %v2529_v4  ;;  %v2585_v17 = vsub.f32 %v7197_v44, %v7209_v42 }
 0x29b   :  { %5312 = vmatpush3.msra.mxu1 %v6852_v36  ;;  %5267 = vmatprep.subr.mxu0 %v8146_v30  ;;  %v4016_v36 = vld [vmem:[%s7920_s1 + $0x1d8] sm:$0xff]  ;;  %8152 = vst [vmem:[#allocation21_spill] sm:$0xff] %v7119_v59  ;;  %v7122_v60 = vsub.f32 %v4018_v52, %v7094_v43  ;;  %v2536_v56 = vsub.f32 %v7092_v45, %v7119_v59 }
 0x29c   :  { %5313 = vmatprep.subr.mxu1 %v6869_v15  ;;  %5268 = vmatpush3.msra.mxu0 %v8146_v30  ;;  %v7108_v25 = vand.u32 4294901760, %v4016_v36  ;;  %v7224_v30 = vand.u32 4294901760, %v7212_v61 }
 0x29d   :  { %5314 = vmatpush3.msra.mxu1 %v6869_v15  ;;  %5269 = vmatprep.subr.mxu0 %v8147_v54  ;;  %v4015_v15 = vld [vmem:[%s7920_s1 + $0x1d0] sm:$0xff]  ;;  %v7140_v10 = vand.u32 4294901760, %v7122_v60 }
 0x29e   :  { %5316 = vmatmul.mubr.f32.vlgmr.msra.gmra.mxu1 %v6893_v14  ;;  %5270 = vmatpush3.msra.mxu0 %v8147_v54  ;;  %v7110_v3 = vand.u32 4294901760, %v4015_v15  ;;  %v7131_v63 = vsub.f32 %v4016_v36, %v7108_v25  ;;  %8160 = vst [vmem:[#allocation3_spill] sm:$0xff] %v7224_v30  ;;  %v7227_v54 = vsub.f32 %v4010_v27, %v7214_v7  ;;  %v4007_v36 = vld [vmem:[%s7920_s1 + $0x190] sm:$0xff] }
 0x29f   :  { %5318 = vmatprep.mubr.f32.mxu1 %v6909_v38  ;;  %5271 = vmatprep.subr.mxu0 %v8148_v9  ;;  %8153 = vst [vmem:[#allocation12_spill] sm:$0xff] %v7140_v10  ;;  %v2543_v28 = vsub.f32 %v7122_v60, %v7140_v10  ;;  %v2592_v39 = vsub.f32 %v7212_v61, %v7224_v30 }
 0x2a0   :  { %5272 = vmatpush3.msra.mxu0 %v8148_v9  ;;  %v7134_v33 = vsub.f32 %v4015_v15, %v7110_v3  ;;  %v7150_v16 = vand.u32 4294901760, %v7131_v63  ;;  %5359 = vmatprep.subr.mxu1 %v2530_v29  ;;  %v7230_v9 = vand.u32 4294901760, %v4009_v12  ;;  %v7239_v8 = vand.u32 4294901760, %v7227_v54 }
 0x2a1   :  { %5273 = vmatprep.subr.mxu0 %v8149_v23  ;;  %5360 = vmatpush3.msra.mxu1 %v2530_v29  ;;  %v2544_v51 = vand.u32 4294901760, %v2543_v28  ;;  %v2593_v15 = vand.u32 4294901760, %v2592_v39  ;;  %v7255_v29 = vand.u32 4294901760, %v4007_v36 }
 0x2a2   :  { %5319 = vmatmul.mubr.f32.gmra.mxu1 %v6902_v5  ;;  %5274 = vmatpush3.msra.mxu0 %v8149_v23  ;;  %8155 = vst [vmem:[#allocation14_spill] sm:$0xff] %v7150_v16  ;;  %v7153_v49 = vand.u32 4294901760, %v7134_v33  ;;  %v2557_v53 = vsub.f32 %v7131_v63, %v7150_v16  ;;  %v4008_v23 = vld [vmem:[%s7920_s1 + $0x198] sm:$0xff]  ;;  %8161 = vst [vmem:[#allocation4_spill] sm:$0xff] %v7239_v8  ;;  %v7244_v40 = vsub.f32 %v4009_v12, %v7230_v9 }
 0x2a3   :  { %5275 = vmatprep.subr.mxu0 %v8150_v24  ;;  %v7241_v52 = vand.u32 4294901760, %v4008_v23 }
 0x2a4   :  { %5276 = vmatpush3.msra.mxu0 %v8150_v24  ;;  %8156 = vst [vmem:[#allocation15_spill] sm:$0xff] %v7153_v49  ;;  %v2564_v18 = vsub.f32 %v7134_v33, %v7153_v49  ;;  %v2558_v37 = vand.u32 4294901760, %v2557_v53  ;;  %v2586_v24 = vand.u32 4294901760, %v2585_v17  ;;  %v7269_v53 = vsub.f32 %v4007_v36, %v7255_v29 }
 0x2a5   :  { %5278 = vmatmul.mubr.f32.vlgmr.msra.gmra.mxu0 %v6893_v14  ;;  %5321 = vmatprep.subr.mxu0 %v7073_v6  ;;  %v7125_v14 = vand.u32 4294901760, %v4014_v2  ;;  %v7253_v4 = vsub.f32 %v4008_v23, %v7241_v52 }
 0x2a6   :  { %5280 = vmatprep.mubr.f32.mxu0 %v6909_v38  ;;  %5322 = vmatpush3.msra.mxu0 %v7073_v6  ;;  %v2550_v38 = vsub.f32 %v7128_v57, %v7147_v58  ;;  %v2565_v19 = vand.u32 4294901760, %v2564_v18 }
 0x2a7   :  { %5323 = vmatprep.subr.mxu0 %v7081_v0  ;;  %v7143_v35 = vsub.f32 %v4014_v2, %v7125_v14  ;;  %v2599_v2 = vsub.f32 %v7227_v54, %v7239_v8 }
 0x2a8   :  { %5324 = vmatpush3.msra.mxu0 %v7081_v0  ;;  %v2551_v55 = vand.u32 4294901760, %v2550_v38  ;;  %v7266_v38 = vand.u32 4294901760, %v7253_v4 }
 0x2a9   :  { %5281 = vmatmul.mubr.f32.gmra.mxu0 %v6902_v5  ;;  %5325 = vmatprep.subr.mxu0 %v7094_v43  ;;  %v2537_v5 = vand.u32 4294901760, %v2536_v56  ;;  %v7159_v1 = vand.u32 4294901760, %v7143_v35  ;;  %v7259_v56 = vand.u32 4294901760, %v7244_v40  ;;  %v2600_v28 = vand.u32 4294901760, %v2599_v2 }
 0x2aa   :  { %5326 = vmatpush3.msra.mxu0 %v7094_v43  ;;  %8163 = vst [vmem:[#allocation6_spill] sm:$0xff] %v7266_v38  ;;  %v2613_v62 = vsub.f32 %v7253_v4, %v7266_v38 }
 0x2ab   :  { %5327 = vmatprep.subr.mxu0 %v7106_v21  ;;  %8157 = vst [vmem:[#allocation18_spill] sm:$0xff] %v7159_v1  ;;  %5361 = vmatprep.subr.mxu1 %v2537_v5  ;;  %v2571_v34 = vsub.f32 %v7143_v35, %v7159_v1  ;;  %8162 = vst [vmem:[#allocation5_spill] sm:$0xff] %v7259_v56  ;;  %v2606_v18 = vsub.f32 %v7244_v40, %v7259_v56 }
 0x2ac   :  { %5328 = vmatpush3.msra.mxu0 %v7106_v21  ;;  %5362 = vmatpush3.msra.mxu1 %v2537_v5  ;;  %v4006_v5 = vld [vmem:[%s7920_s1 + $0x188] sm:$0xff]  ;;  %v2614_v11 = vand.u32 4294901760, %v2613_v62 }
 0x2ad   :  { %5329 = vmatprep.subr.mxu0 %v7108_v25  ;;  %5363 = vmatprep.subr.mxu1 %v2544_v51  ;;  %v2572_v46 = vand.u32 4294901760, %v2571_v34 }
 0x2ae   :  { %5330 = vmatpush3.msra.mxu0 %v7108_v25  ;;  %5364 = vmatpush3.msra.mxu1 %v2544_v51  ;;  %v7271_v51 = vand.u32 4294901760, %v4006_v5 }
 0x2af   :  { %5331 = vmatprep.subr.mxu0 %v7110_v3  ;;  %5365 = vmatprep.subr.mxu1 %v2551_v55 }
 0x2b0   :  { %5332 = vmatpush3.msra.mxu0 %v7110_v3  ;;  %5366 = vmatpush3.msra.mxu1 %v2551_v55  ;;  %v4005_v55 = vld [vmem:[%s7920_s1 + $0x180] sm:$0xff]  ;;  %v7286_v34 = vsub.f32 %v4006_v5, %v7271_v51 }
 0x2b1   :  { %5333 = vmatprep.subr.mxu0 %v7125_v14  ;;  %5367 = vmatprep.subr.mxu1 %v2558_v37  ;;  %v7288_v31 = vand.u32 4294901760, %v4005_v55 }
 0x2b2   :  { %5334 = vmatpush3.msra.mxu0 %v7125_v14  ;;  %5368 = vmatpush3.msra.mxu1 %v2558_v37  ;;  %v7283_v37 = vand.u32 4294901760, %v7269_v53  ;;  %8165 = vst [vmem:[#allocation8_spill] sm:$0xff] %v7286_v34  ;;  %v7295_v27 = vand.u32 4294901760, %v7286_v34 }
 0x2b3   :  { %5335 = vmatprep.subr.mxu0 %v7176_v32  ;;  %5369 = vmatprep.subr.mxu1 %v2565_v19  ;;  %v7298_v13 = vsub.f32 %v4005_v55, %v7288_v31 }
 0x2b4   :  { %5336 = vmatpush3.msra.mxu0 %v7176_v32  ;;  %5370 = vmatpush3.msra.mxu1 %v2565_v19  ;;  %8164 = vst [vmem:[#allocation7_spill] sm:$0xff] %v7283_v37  ;;  %v2607_v19 = vand.u32 4294901760, %v2606_v18  ;;  %8166 = vst [vmem:[#allocation9_spill] sm:$0xff] %v7295_v27 }
 0x2b5   :  { %5337 = vmatprep.subr.mxu0 %v7186_v48  ;;  %5371 = vmatprep.subr.mxu1 %v2572_v46  ;;  %8167 = vst [vmem:[#allocation10_spill] sm:$0xff] %v7298_v13  ;;  %v7305_v17 = vand.u32 4294901760, %v7298_v13 }
 0x2b6   :  { %5338 = vmatpush3.msra.mxu0 %v7186_v48  ;;  %5372 = vmatpush3.msra.mxu1 %v2572_v46  ;;  %v2620_v46 = vsub.f32 %v7269_v53, %v7283_v37 }
 0x2b7   :  { %5339 = vmatprep.subr.mxu0 %v7199_v20  ;;  %5373 = vmatprep.subr.mxu1 %v2579_v47  ;;  %8168 = vst [vmem:[#allocation11_spill] sm:$0xff] %v7305_v17 }
 0x2b8   :  { %5340 = vmatpush3.msra.mxu0 %v7199_v20  ;;  %5374 = vmatpush3.msra.mxu1 %v2579_v47  ;;  %v2621_v12 = vand.u32 4294901760, %v2620_v46  ;;  %v2627_v47 = vsub.f32 %v7286_v34, %v7295_v27 }
 0x2b9   :  { %5341 = vmatprep.subr.mxu0 %v7214_v7  ;;  %5375 = vmatprep.subr.mxu1 %v2586_v24 }
 0x2ba   :  { %5342 = vmatpush3.msra.mxu0 %v7214_v7  ;;  %5376 = vmatpush3.msra.mxu1 %v2586_v24  ;;  %v2628_v23 = vand.u32 4294901760, %v2627_v47  ;;  %v2634_v24 = vsub.f32 %v7298_v13, %v7305_v17 }
 0x2bb   :  { %5343 = vmatprep.subr.mxu0 %v7230_v9  ;;  %5377 = vmatprep.subr.mxu1 %v2593_v15 }
 0x2bc   :  { %5344 = vmatpush3.msra.mxu0 %v7230_v9  ;;  %5378 = vmatpush3.msra.mxu1 %v2593_v15  ;;  %v2635_v39 = vand.u32 4294901760, %v2634_v24 }
 0x2bd   :  { %5345 = vmatprep.subr.mxu0 %v7241_v52  ;;  %5379 = vmatprep.subr.mxu1 %v2600_v28 }
 0x2be   :  { %5346 = vmatpush3.msra.mxu0 %v7241_v52  ;;  %5380 = vmatpush3.msra.mxu1 %v2600_v28 }
 0x2bf   :  { %5347 = vmatprep.subr.mxu0 %v7255_v29  ;;  %5381 = vmatprep.subr.mxu1 %v2607_v19 }
 0x2c0   :  { %5348 = vmatpush3.msra.mxu0 %v7255_v29  ;;  %5382 = vmatpush3.msra.mxu1 %v2607_v19 }
 0x2c1   :  { %5349 = vmatprep.subr.mxu0 %v7271_v51  ;;  %5383 = vmatprep.subr.mxu1 %v2614_v11 }
 0x2c2   :  { %5350 = vmatpush3.msra.mxu0 %v7271_v51  ;;  %5384 = vmatpush3.msra.mxu1 %v2614_v11 }
 0x2c3   :  { %5351 = vmatprep.subr.mxu0 %v7288_v31  ;;  %5385 = vmatprep.subr.mxu1 %v2621_v12 }
 0x2c4   :  { %5352 = vmatpush3.msra.mxu0 %v7288_v31  ;;  %5386 = vmatpush3.msra.mxu1 %v2621_v12 }
 0x2c5   :  { %5397 = vmatprep.subr.mxu0 %v7079_v41  ;;  %5387 = vmatprep.subr.mxu1 %v2628_v23 }
 0x2c6   :  { %5388 = vmatpush3.msra.mxu1 %v2628_v23 }
 0x2c7   :  { %5389 = vmatprep.subr.mxu1 %v2635_v39 }
 0x2c8   :  { %5390 = vmatpush3.msra.mxu1 %v2635_v39 }
 0x2c9   :  { %5435 = vmatprep.subr.mxu1 %v7073_v6 }
 0x318   :  { %v5165_v36 = vpop.f32.mrf.mxu1 }
 0x31a   :  { %v1881_v15 = vpop.f32.mrf.mxu1 }
 0x31c   :  { %v5168_v5 = vpop.f32.mrf.mxu1 }
 0x31e   :  { %v1893_v18 = vpop.f32.mrf.mxu1 }
 0x320   :  { %v5127_v2 = vpop.f32.mrf.mxu0 }
 0x321   :  { %v1888_v24 = vadd.f32 %v5165_v36, %v5127_v2 }
 0x322   :  { %v1700_v28 = vpop.f32.mrf.mxu0 }
 0x323   :  { %v1882_v27 = vadd.f32 %v1881_v15, %v1700_v28 }
 0x325   :  { %v5130_v55 = vpop.f32.mrf.mxu0 }
 0x326   :  { %v1900_v38 = vadd.f32 %v5168_v5, %v5130_v55 }
 0x327   :  { %v1720_v19 = vpop.f32.mrf.mxu0 }
 0x328   :  { %v1894_v30 = vadd.f32 %v1893_v18, %v1720_v19 }
 0x33a   :  { %v5241_v62 = vpop.f32.mrf.mxu1 }
 0x33c   :  { %v2113_v11 = vpop.f32.mrf.mxu1 }
 0x33f   :  { %v5244_v47 = vpop.f32.mrf.mxu1 }
 0x341   :  { %v2129_v17 = vpop.f32.mrf.mxu1 }
 0x343   :  { %v5203_v46 = vpop.f32.mrf.mxu0 }
 0x344   :  { %v2011_v39 = vadd.f32 %v5203_v46, %v1888_v24 }
 0x345   :  { %v2003_v12 = vpop.f32.mrf.mxu0 }
 0x346   :  { %v2004_v56 = vadd.f32 %v2003_v12, %v1882_v27  ;;  %v2122_v26 = vadd.f32 %v5241_v62, %v2011_v39 }
 0x348   :  { %v5206_v23 = vpop.f32.mrf.mxu0  ;;  %v2114_v10 = vadd.f32 %v2113_v11, %v2004_v56 }
 0x349   :  { %v2025_v42 = vadd.f32 %v5206_v23, %v1900_v38 }
 0x34a   :  { %v2017_v8 = vpop.f32.mrf.mxu0 }
 0x34b   :  { %v2018_v16 = vadd.f32 %v2017_v8, %v1894_v30  ;;  %v2138_v36 = vadd.f32 %v5244_v47, %v2025_v42 }
 0x34d   :  { %v2130_v5 = vadd.f32 %v2129_v17, %v2018_v16 }
 0x35e   :  { %v5317_v37 = vpop.f32.mrf.mxu1 }
 0x360   :  { %v2361_v1 = vpop.f32.mrf.mxu1 }
 0x362   :  { %v5320_v2 = vpop.f32.mrf.mxu1 }
 0x364   :  { %v2373_v19 = vpop.f32.mrf.mxu1 }
 0x365   :  { %v5279_v49 = vpop.f32.mrf.mxu0 }
 0x366   :  { %v2263_v58 = vadd.f32 %v5279_v49, %v2122_v26 }
 0x367   :  { %v2256_v59 = vpop.f32.mrf.mxu0 }
 0x368   :  { %v2368_v22 = vadd.f32 %v5317_v37, %v2263_v58  ;;  %v2257_v13 = vadd.f32 %v2256_v59, %v2114_v10 }
 0x369   :  { %v5282_v34 = vpop.f32.mrf.mxu0 }
 0x36a   :  { %v2384_v15 = vmax.f32 %v2368_v22, 0.0  ;;  %v2362_v28 = vadd.f32 %v2361_v1, %v2257_v13  ;;  %v2275_v46 = vadd.f32 %v5282_v34, %v2138_v36 }
 0x36b   :  { %v2268_v27 = vpop.f32.mrf.mxu0 }
 0x36c   :  { %v7312_v55 = vand.u32 4294901760, %v2384_v15  ;;  %v2383_v38 = vmax.f32 %v2362_v28, 0.0  ;;  %v2380_v18 = vadd.f32 %v5320_v2, %v2275_v46  ;;  %v2269_v62 = vadd.f32 %v2268_v27, %v2130_v5  ;;  %v4030_v28 = vld [vmem:[%s7920_s1 + $0x248] sm:$0xff] }
 0x36e   :  { %v7315_v49 = vsub.f32 %v2384_v15, %v7312_v55  ;;  %v7317_v26 = vand.u32 4294901760, %v2383_v38  ;;  %v2386_v59 = vmax.f32 %v2380_v18, 0.0  ;;  %v2374_v10 = vadd.f32 %v2373_v19, %v2269_v62 }
 0x370   :  { %v2497_v58 = vand.u32 4294901760, %v7315_v49  ;;  %v2486_v22 = vsub.f32 %v2383_v38, %v7317_v26  ;;  %v7321_v1 = vand.u32 4294901760, %v2386_v59  ;;  %v2385_v16 = vmax.f32 %v2374_v10, 0.0  ;;  %5391 = vmatprep.mubr.f32.mxu1 %v7317_v26 }
 0x371   :  { %5392 = vmatmul.mubr.f32.vlgmr.msra.gmra.mxu1 %v7312_v55 }
 0x372   :  { %v7326_v42 = vsub.f32 %v2386_v59, %v7321_v1  ;;  %v7328_v30 = vand.u32 4294901760, %v2385_v16  ;;  %5436 = vmatpush3.msra.mxu1 %v7073_v6  ;;  %v2487_v8 = vand.u32 4294901760, %v2486_v22  ;;  %v2498_v56 = vsub.f32 %v7315_v49, %v2497_v58 }
 0x373   :  { %5437 = vmatprep.subr.mxu1 %v7081_v0 }
 0x374   :  { %v7336_v37 = vsub.f32 %v2385_v16, %v7328_v30  ;;  %5438 = vmatpush3.msra.mxu1 %v7081_v0  ;;  %5394 = vmatprep.mubr.f32.mxu1 %v7328_v30  ;;  %v2488_v34 = vsub.f32 %v2486_v22, %v2487_v8  ;;  %v2517_v13 = vand.u32 4294901760, %v7326_v42  ;;  %v2499_v47 = vand.u32 4294901760, %v2498_v56 }
 0x375   :  { %5439 = vmatprep.subr.mxu1 %v7094_v43  ;;  %5395 = vmatmul.mubr.f32.gmra.mxu1 %v7321_v1 }
 0x376   :  { %5440 = vmatpush3.msra.mxu1 %v7094_v43  ;;  %5467 = vmatprep.mubr.f32.mxu1 %v2487_v8  ;;  %v2489_v17 = vand.u32 4294901760, %v2488_v34  ;;  %v2507_v11 = vand.u32 4294901760, %v7336_v37  ;;  %v2518_v24 = vsub.f32 %v7326_v42, %v2517_v13 }
 0x377   :  { %5441 = vmatprep.subr.mxu1 %v7106_v21 }
 0x378   :  { %5442 = vmatpush3.msra.mxu1 %v7106_v21  ;;  %5353 = vmatprep.mubr.f32.mxu0 %v2489_v17  ;;  %v2508_v12 = vsub.f32 %v7336_v37, %v2507_v11  ;;  %v2519_v39 = vand.u32 4294901760, %v2518_v24 }
 0x379   :  { %5443 = vmatprep.subr.mxu1 %v7108_v25  ;;  %5354 = vmatmul.mubr.f32.vlgmr.msra.gmra.mxu0 %v2499_v47 }
 0x37a   :  { %5398 = vmatpush3.msra.mxu0 %v7079_v41  ;;  %5444 = vmatpush3.msra.mxu1 %v7108_v25  ;;  %v2509_v23 = vand.u32 4294901760, %v2508_v12  ;;  %v8169_v41 = vld [vmem:[#allocation8_spill] sm:$0xff]  ;;  %v4028_v12 = vld [vmem:[%s7920_s1 + $0x238] sm:$0xff] }
 0x37b   :  { %5399 = vmatprep.subr.mxu0 %v7092_v45  ;;  %5445 = vmatprep.subr.mxu1 %v7110_v3 }
 0x37c   :  { %5400 = vmatpush3.msra.mxu0 %v7092_v45  ;;  %5446 = vmatpush3.msra.mxu1 %v7110_v3  ;;  %v8172_v45 = vld [vmem:[#allocation21_spill] sm:$0xff] }
 0x37d   :  { %5356 = vmatprep.mubr.f32.mxu0 %v2509_v23  ;;  %5401 = vmatprep.subr.mxu0 %v7122_v60 }
 0x37e   :  { %5447 = vmatprep.subr.mxu1 %v7125_v14  ;;  %5357 = vmatmul.mubr.f32.gmra.mxu0 %v2519_v39  ;;  %v7605_v39 = vand.u32 4294901760, %v4028_v12 }
 0x37f   :  { %5402 = vmatpush3.msra.mxu0 %v7122_v60  ;;  %5448 = vmatpush3.msra.mxu1 %v7125_v14  ;;  %v8177_v60 = vld [vmem:[#allocation18_spill] sm:$0xff] }
 0x380   :  { %5403 = vmatprep.subr.mxu0 %v7128_v57  ;;  %5429 = vmatprep.mubr.f32.mxu0 %v2486_v22 }
 0x381   :  { %5449 = vmatprep.subr.mxu1 %v7176_v32  ;;  %5404 = vmatpush3.msra.mxu0 %v7128_v57  ;;  %v8179_v57 = vld [vmem:[#allocation2_spill] sm:$0xff] }
 0x382   :  { %5450 = vmatpush3.msra.mxu1 %v7176_v32  ;;  %5405 = vmatprep.subr.mxu0 %v7131_v63 }
 0x383   :  { %5451 = vmatprep.subr.mxu1 %v7186_v48  ;;  %5406 = vmatpush3.msra.mxu0 %v7131_v63  ;;  %v8180_v63 = vld [vmem:[#allocation3_spill] sm:$0xff] }
 0x384   :  { %5452 = vmatpush3.msra.mxu1 %v7186_v48  ;;  %5407 = vmatprep.subr.mxu0 %v7134_v33 }
 0x385   :  { %5453 = vmatprep.subr.mxu1 %v7199_v20  ;;  %5408 = vmatpush3.msra.mxu0 %v7134_v33  ;;  %v8181_v33 = vld [vmem:[#allocation4_spill] sm:$0xff] }
 0x386   :  { %5454 = vmatpush3.msra.mxu1 %v7199_v20  ;;  %5409 = vmatprep.subr.mxu0 %v7143_v35 }
 0x387   :  { %5455 = vmatprep.subr.mxu1 %v7214_v7  ;;  %5410 = vmatpush3.msra.mxu0 %v7143_v35  ;;  %v8182_v35 = vld [vmem:[#allocation5_spill] sm:$0xff] }
 0x388   :  { %5456 = vmatpush3.msra.mxu1 %v7214_v7  ;;  %5411 = vmatprep.subr.mxu0 %v7184_v50 }
 0x389   :  { %5457 = vmatprep.subr.mxu1 %v7230_v9  ;;  %5412 = vmatpush3.msra.mxu0 %v7184_v50  ;;  %v8184_v50 = vld [vmem:[#allocation7_spill] sm:$0xff] }
 0x38a   :  { %5458 = vmatpush3.msra.mxu1 %v7230_v9  ;;  %5413 = vmatprep.subr.mxu0 %v7197_v44 }
 0x38b   :  { %5459 = vmatprep.subr.mxu1 %v7241_v52  ;;  %5414 = vmatpush3.msra.mxu0 %v7197_v44  ;;  %v8186_v44 = vld [vmem:[#allocation11_spill] sm:$0xff] }
 0x38c   :  { %5460 = vmatpush3.msra.mxu1 %v7241_v52  ;;  %5415 = vmatprep.subr.mxu0 %v7212_v61 }
 0x38d   :  { %5461 = vmatprep.subr.mxu1 %v7255_v29  ;;  %5416 = vmatpush3.msra.mxu0 %v7212_v61 }
 0x38e   :  { %5462 = vmatpush3.msra.mxu1 %v7255_v29  ;;  %5417 = vmatprep.subr.mxu0 %v7227_v54 }
 0x38f   :  { %5463 = vmatprep.subr.mxu1 %v7271_v51  ;;  %5418 = vmatpush3.msra.mxu0 %v7227_v54 }
 0x390   :  { %5464 = vmatpush3.msra.mxu1 %v7271_v51  ;;  %5419 = vmatprep.subr.mxu0 %v7244_v40 }
 0x391   :  { %5465 = vmatprep.subr.mxu1 %v7288_v31  ;;  %5420 = vmatpush3.msra.mxu0 %v7244_v40 }
 0x392   :  { %5466 = vmatpush3.msra.mxu1 %v7288_v31  ;;  %5421 = vmatprep.subr.mxu0 %v7253_v4 }
 0x393   :  { %5468 = vmatmul.mubr.f32.vlgmr.msra.gmra.mxu1 %v2497_v58  ;;  %5511 = vmatprep.subr.mxu1 %v7073_v6 }
 0x394   :  { %5422 = vmatpush3.msra.mxu0 %v7253_v4  ;;  %5470 = vmatprep.mubr.f32.mxu1 %v2507_v11 }
 0x395   :  { %5512 = vmatpush3.msra.mxu1 %v7073_v6  ;;  %5423 = vmatprep.subr.mxu0 %v7269_v53  ;;  %v8170_v6 = vld [vmem:[#allocation10_spill] sm:$0xff] }
 0x396   :  { %5513 = vmatprep.subr.mxu1 %v7081_v0  ;;  %5424 = vmatpush3.msra.mxu0 %v7269_v53  ;;  %v4033_v53 = vld [vmem:[%s7920_s1 + $0x260] sm:$0xff] }
 0x397   :  { %5514 = vmatpush3.msra.mxu1 %v7081_v0  ;;  %5425 = vmatprep.subr.mxu0 %v8169_v41  ;;  %v8171_v0 = vld [vmem:[#allocation19_spill] sm:$0xff]  ;;  %v7525_v36 = vand.u32 4294901760, %v4033_v53 }
 0x398   :  { %5471 = vmatmul.mubr.f32.gmra.mxu1 %v2517_v13  ;;  %5515 = vmatprep.subr.mxu1 %v7094_v43  ;;  %v4029_v13 = vld [vmem:[%s7920_s1 + $0x240] sm:$0xff] }
 0x399   :  { %5426 = vmatpush3.msra.mxu0 %v8169_v41  ;;  %5516 = vmatpush3.msra.mxu1 %v7094_v43  ;;  %v8173_v43 = vld [vmem:[#allocation12_spill] sm:$0xff]  ;;  %v7547_v38 = vsub.f32 %v4033_v53, %v7525_v36  ;;  %v7595_v47 = vand.u32 4294901760, %v4029_v13 }
 0x39a   :  { %5543 = vmatprep.mubr.f32.mxu1 %v7317_v26  ;;  %5427 = vmatprep.subr.mxu0 %v8170_v6  ;;  %v4027_v41 = vld [vmem:[%s7920_s1 + $0x230] sm:$0xff] }
 0x39b   :  { %5517 = vmatprep.subr.mxu1 %v7106_v21  ;;  %5428 = vmatpush3.msra.mxu0 %v8170_v6  ;;  %v7566_v10 = vand.u32 4294901760, %v7547_v38  ;;  %v7603_v23 = vsub.f32 %v4029_v13, %v7595_v47 }
 0x39c   :  { %5518 = vmatpush3.msra.mxu1 %v7106_v21  ;;  %5430 = vmatmul.mubr.f32.vlgmr.msra.gmra.mxu0 %v7315_v49  ;;  %v8174_v21 = vld [vmem:[#allocation16_spill] sm:$0xff] }
 0x39d   :  { %5473 = vmatprep.subr.mxu0 %v8171_v0  ;;  %5519 = vmatprep.subr.mxu1 %v7108_v25  ;;  %8190 = vst [vmem:[#allocation10_spill] sm:$0xff] %v7566_v10 }
 0x39e   :  { %5432 = vmatprep.mubr.f32.mxu0 %v7336_v37  ;;  %5474 = vmatpush3.msra.mxu0 %v8171_v0  ;;  %v7613_v0 = vand.u32 4294901760, %v7603_v23 }
 0x39f   :  { %5520 = vmatpush3.msra.mxu1 %v7108_v25  ;;  %5475 = vmatprep.subr.mxu0 %v8172_v45  ;;  %v8175_v25 = vld [vmem:[#allocation14_spill] sm:$0xff] }
 0x3a0   :  { %5521 = vmatprep.subr.mxu1 %v7110_v3  ;;  %5476 = vmatpush3.msra.mxu0 %v8172_v45  ;;  %8194 = vst [vmem:[#allocation16_spill] sm:$0xff] %v7613_v0  ;;  %v7616_v45 = vsub.f32 %v4028_v12, %v7605_v39 }
 0x3a1   :  { %5522 = vmatpush3.msra.mxu1 %v7110_v3  ;;  %5433 = vmatmul.mubr.f32.gmra.mxu0 %v7326_v42  ;;  %v8176_v3 = vld [vmem:[#allocation15_spill] sm:$0xff] }
 0x3a2   :  { %5477 = vmatprep.subr.mxu0 %v8173_v43  ;;  %5523 = vmatprep.subr.mxu1 %v7125_v14 }
 0x3a3   :  { %5478 = vmatpush3.msra.mxu0 %v8173_v43  ;;  %5505 = vmatprep.mubr.f32.mxu0 %v7317_v26  ;;  %v7618_v43 = vand.u32 4294901760, %v4027_v41 }
 0x3a4   :  { %5524 = vmatpush3.msra.mxu1 %v7125_v14  ;;  %5479 = vmatprep.subr.mxu0 %v8174_v21  ;;  %v8178_v14 = vld [vmem:[#allocation20_spill] sm:$0xff] }
 0x3a5   :  { %5525 = vmatprep.subr.mxu1 %v7176_v32  ;;  %5480 = vmatpush3.msra.mxu0 %v8174_v21  ;;  %v4026_v21 = vld [vmem:[%s7920_s1 + $0x228] sm:$0xff] }
 0x3a6   :  { %5526 = vmatpush3.msra.mxu1 %v7176_v32  ;;  %5481 = vmatprep.subr.mxu0 %v8175_v25  ;;  %v8183_v32 = vld [vmem:[#allocation6_spill] sm:$0xff] }
 0x3a7   :  { %5527 = vmatprep.subr.mxu1 %v7186_v48  ;;  %5482 = vmatpush3.msra.mxu0 %v8175_v25  ;;  %v3369_v25 = vsub.f32 %v7603_v23, %v7613_v0 }
 0x3a8   :  { %5528 = vmatpush3.msra.mxu1 %v7186_v48  ;;  %5483 = vmatprep.subr.mxu0 %v8176_v3  ;;  %v8185_v48 = vld [vmem:[#allocation9_spill] sm:$0xff] }
 0x3a9   :  { %5529 = vmatprep.subr.mxu1 %v7199_v20  ;;  %5484 = vmatpush3.msra.mxu0 %v8176_v3  ;;  %v7628_v3 = vand.u32 4294901760, %v7616_v45 }
 0x3aa   :  { %5530 = vmatpush3.msra.mxu1 %v7199_v20  ;;  %5485 = vmatprep.subr.mxu0 %v8177_v60  ;;  %v4036_v20 = vld [vmem:[%s7920_s1 + $0x278] sm:$0xff] }
 0x3ab   :  { %5531 = vmatprep.subr.mxu1 %v7214_v7  ;;  %5486 = vmatpush3.msra.mxu0 %v8177_v60  ;;  %v7492_v61 = vand.u32 4294901760, %v4036_v20  ;;  %8195 = vst [vmem:[#allocation14_spill] sm:$0xff] %v7628_v3  ;;  %v7631_v60 = vsub.f32 %v4027_v41, %v7618_v43 }
 0x3ac   :  { %5532 = vmatpush3.msra.mxu1 %v7214_v7  ;;  %5487 = vmatprep.subr.mxu0 %v8178_v14  ;;  %v4035_v7 = vld [vmem:[%s7920_s1 + $0x270] sm:$0xff] }
 0x3ad   :  { %5533 = vmatprep.subr.mxu1 %v7230_v9  ;;  %5488 = vmatpush3.msra.mxu0 %v8178_v14  ;;  %v7498_v54 = vsub.f32 %v4036_v20, %v7492_v61  ;;  %v7633_v14 = vand.u32 4294901760, %v4026_v21 }
 0x3ae   :  { %5534 = vmatpush3.msra.mxu1 %v7230_v9  ;;  %5489 = vmatprep.subr.mxu0 %v8179_v57  ;;  %v7500_v9 = vand.u32 4294901760, %v4035_v7 }
 0x3af   :  { %5535 = vmatprep.subr.mxu1 %v7241_v52  ;;  %5490 = vmatpush3.msra.mxu0 %v8179_v57  ;;  %v7508_v40 = vand.u32 4294901760, %v7498_v54  ;;  %v4025_v57 = vld [vmem:[%s7920_s1 + $0x220] sm:$0xff] }
 0x3b0   :  { %5536 = vmatpush3.msra.mxu1 %v7241_v52  ;;  %5491 = vmatprep.subr.mxu0 %v8180_v63  ;;  %v4034_v52 = vld [vmem:[%s7920_s1 + $0x268] sm:$0xff]  ;;  %v7511_v4 = vsub.f32 %v4035_v7, %v7500_v9 }
 0x3b1   :  { %5537 = vmatprep.subr.mxu1 %v7255_v29  ;;  %5492 = vmatpush3.msra.mxu0 %v8180_v63  ;;  %8187 = vst [vmem:[#allocation13_spill] sm:$0xff] %v7508_v40  ;;  %v3320_v46 = vsub.f32 %v7498_v54, %v7508_v40  ;;  %v3370_v63 = vand.u32 4294901760, %v3369_v25 }
 0x3b2   :  { %5538 = vmatpush3.msra.mxu1 %v7255_v29  ;;  %5493 = vmatprep.subr.mxu0 %v8181_v33  ;;  %v7513_v29 = vand.u32 4294901760, %v4034_v52  ;;  %v7538_v5 = vand.u32 4294901760, %v7511_v4 }
 0x3b3   :  { %5539 = vmatprep.subr.mxu1 %v7271_v51  ;;  %5494 = vmatpush3.msra.mxu0 %v8181_v33  ;;  %v3321_v19 = vand.u32 4294901760, %v3320_v46  ;;  %v3376_v33 = vsub.f32 %v7616_v45, %v7628_v3 }
 0x3b4   :  { %5540 = vmatpush3.msra.mxu1 %v7271_v51  ;;  %5495 = vmatprep.subr.mxu0 %v8182_v35  ;;  %v4032_v51 = vld [vmem:[%s7920_s1 + $0x258] sm:$0xff]  ;;  %8188 = vst [vmem:[#allocation17_spill] sm:$0xff] %v7538_v5  ;;  %v7541_v27 = vsub.f32 %v4034_v52, %v7513_v29  ;;  %v3327_v49 = vsub.f32 %v7511_v4, %v7538_v5 }
 0x3b5   :  { %5541 = vmatprep.subr.mxu1 %v7288_v31  ;;  %5496 = vmatpush3.msra.mxu0 %v8182_v35  ;;  %v7527_v2 = vand.u32 4294901760, %v4032_v51  ;;  %v7643_v35 = vand.u32 4294901760, %v7631_v60 }
 0x3b6   :  { %5542 = vmatpush3.msra.mxu1 %v7288_v31  ;;  %5497 = vmatprep.subr.mxu0 %v8183_v32  ;;  %v4031_v31 = vld [vmem:[%s7920_s1 + $0x250] sm:$0xff]  ;;  %v7559_v26 = vand.u32 4294901760, %v7541_v27 }
 0x3b7   :  { %5544 = vmatmul.mubr.f32.vlgmr.msra.gmra.mxu1 %v7312_v55  ;;  %5498 = vmatpush3.msra.mxu0 %v8183_v32  ;;  %v7529_v15 = vand.u32 4294901760, %v4031_v31  ;;  %v7550_v18 = vsub.f32 %v4032_v51, %v7527_v2  ;;  %8196 = vst [vmem:[#allocation15_spill] sm:$0xff] %v7643_v35  ;;  %v7646_v32 = vsub.f32 %v4026_v21, %v7633_v14  ;;  %v4023_v51 = vld [vmem:[%s7920_s1 + $0x210] sm:$0xff] }
 0x3b8   :  { %5546 = vmatprep.mubr.f32.mxu1 %v7328_v30  ;;  %5499 = vmatprep.subr.mxu0 %v8184_v50  ;;  %8189 = vst [vmem:[#allocation8_spill] sm:$0xff] %v7559_v26  ;;  %v3334_v16 = vsub.f32 %v7541_v27, %v7559_v26  ;;  %v3383_v20 = vsub.f32 %v7631_v60, %v7643_v35 }
 0x3b9   :  { %5500 = vmatpush3.msra.mxu0 %v8184_v50  ;;  %v7553_v62 = vsub.f32 %v4031_v31, %v7529_v15  ;;  %v7569_v58 = vand.u32 4294901760, %v7550_v18  ;;  %5587 = vmatprep.subr.mxu1 %v3321_v19  ;;  %v7649_v50 = vand.u32 4294901760, %v4025_v57  ;;  %v7658_v7 = vand.u32 4294901760, %v7646_v32 }
 0x3ba   :  { %5501 = vmatprep.subr.mxu0 %v8185_v48  ;;  %5588 = vmatpush3.msra.mxu1 %v3321_v19  ;;  %v3335_v56 = vand.u32 4294901760, %v3334_v16  ;;  %v3384_v31 = vand.u32 4294901760, %v3383_v20  ;;  %v7674_v19 = vand.u32 4294901760, %v4023_v51 }
 0x3bb   :  { %5547 = vmatmul.mubr.f32.gmra.mxu1 %v7321_v1  ;;  %5502 = vmatpush3.msra.mxu0 %v8185_v48  ;;  %8191 = vst [vmem:[#allocation19_spill] sm:$0xff] %v7569_v58  ;;  %v7572_v22 = vand.u32 4294901760, %v7553_v62  ;;  %v3348_v8 = vsub.f32 %v7550_v18, %v7569_v58  ;;  %v4024_v48 = vld [vmem:[%s7920_s1 + $0x218] sm:$0xff]  ;;  %8197 = vst [vmem:[#allocation18_spill] sm:$0xff] %v7658_v7  ;;  %v7663_v53 = vsub.f32 %v4025_v57, %v7649_v50 }
 0x3bc   :  { %5503 = vmatprep.subr.mxu0 %v8186_v44  ;;  %v7660_v52 = vand.u32 4294901760, %v4024_v48 }
 0x3bd   :  { %5504 = vmatpush3.msra.mxu0 %v8186_v44  ;;  %8192 = vst [vmem:[#allocation21_spill] sm:$0xff] %v7572_v22  ;;  %v3355_v37 = vsub.f32 %v7553_v62, %v7572_v22  ;;  %v3349_v17 = vand.u32 4294901760, %v3348_v8  ;;  %v3377_v44 = vand.u32 4294901760, %v3376_v33  ;;  %v7688_v8 = vsub.f32 %v4023_v51, %v7674_v19 }
 0x3be   :  { %5506 = vmatmul.mubr.f32.vlgmr.msra.gmra.mxu0 %v7312_v55  ;;  %5549 = vmatprep.subr.mxu0 %v7492_v61  ;;  %v7544_v55 = vand.u32 4294901760, %v4030_v28  ;;  %v7672_v46 = vsub.f32 %v4024_v48, %v7660_v52 }
 0x3bf   :  { %5508 = vmatprep.mubr.f32.mxu0 %v7328_v30  ;;  %5550 = vmatpush3.msra.mxu0 %v7492_v61  ;;  %v3341_v30 = vsub.f32 %v7547_v38, %v7566_v10  ;;  %v3356_v24 = vand.u32 4294901760, %v3355_v37 }
 0x3c0   :  { %5551 = vmatprep.subr.mxu0 %v7500_v9  ;;  %v7562_v59 = vsub.f32 %v4030_v28, %v7544_v55  ;;  %v3390_v28 = vsub.f32 %v7646_v32, %v7658_v7 }
 0x3c1   :  { %5552 = vmatpush3.msra.mxu0 %v7500_v9  ;;  %v3342_v34 = vand.u32 4294901760, %v3341_v30  ;;  %v7685_v30 = vand.u32 4294901760, %v7672_v46 }
 0x3c2   :  { %5509 = vmatmul.mubr.f32.gmra.mxu0 %v7321_v1  ;;  %5553 = vmatprep.subr.mxu0 %v7513_v29  ;;  %v3328_v1 = vand.u32 4294901760, %v3327_v49  ;;  %v7578_v42 = vand.u32 4294901760, %v7562_v59  ;;  %v7678_v49 = vand.u32 4294901760, %v7663_v53  ;;  %v3391_v16 = vand.u32 4294901760, %v3390_v28 }
 0x3c3   :  { %5554 = vmatpush3.msra.mxu0 %v7513_v29  ;;  %8199 = vst [vmem:[#allocation2_spill] sm:$0xff] %v7685_v30  ;;  %v3404_v13 = vsub.f32 %v7672_v46, %v7685_v30 }
 0x3c4   :  { %5555 = vmatprep.subr.mxu0 %v7525_v36  ;;  %8193 = vst [vmem:[#allocation12_spill] sm:$0xff] %v7578_v42  ;;  %5589 = vmatprep.subr.mxu1 %v3328_v1  ;;  %v3362_v11 = vsub.f32 %v7562_v59, %v7578_v42  ;;  %8198 = vst [vmem:[#allocation20_spill] sm:$0xff] %v7678_v49  ;;  %v3397_v37 = vsub.f32 %v7663_v53, %v7678_v49 }
 0x3c5   :  { %5556 = vmatpush3.msra.mxu0 %v7525_v36  ;;  %5590 = vmatpush3.msra.mxu1 %v3328_v1  ;;  %v4022_v1 = vld [vmem:[%s7920_s1 + $0x208] sm:$0xff]  ;;  %v3405_v41 = vand.u32 4294901760, %v3404_v13 }
 0x3c6   :  { %5557 = vmatprep.subr.mxu0 %v7527_v2  ;;  %5591 = vmatprep.subr.mxu1 %v3335_v56  ;;  %v3363_v6 = vand.u32 4294901760, %v3362_v11 }
 0x3c7   :  { %5558 = vmatpush3.msra.mxu0 %v7527_v2  ;;  %5592 = vmatpush3.msra.mxu1 %v3335_v56  ;;  %v7690_v56 = vand.u32 4294901760, %v4022_v1 }
 0x3c8   :  { %5559 = vmatprep.subr.mxu0 %v7529_v15  ;;  %5593 = vmatprep.subr.mxu1 %v3342_v34 }
 0x3c9   :  { %5560 = vmatpush3.msra.mxu0 %v7529_v15  ;;  %5594 = vmatpush3.msra.mxu1 %v3342_v34  ;;  %v4021_v34 = vld [vmem:[%s7920_s1 + $0x200] sm:$0xff]  ;;  %v7705_v11 = vsub.f32 %v4022_v1, %v7690_v56 }
 0x3ca   :  { %5561 = vmatprep.subr.mxu0 %v7544_v55  ;;  %5595 = vmatprep.subr.mxu1 %v3349_v17  ;;  %v7707_v12 = vand.u32 4294901760, %v4021_v34 }
 0x3cb   :  { %5562 = vmatpush3.msra.mxu0 %v7544_v55  ;;  %5596 = vmatpush3.msra.mxu1 %v3349_v17  ;;  %v7702_v17 = vand.u32 4294901760, %v7688_v8  ;;  %8201 = vst [vmem:[#allocation4_spill] sm:$0xff] %v7705_v11  ;;  %v7714_v21 = vand.u32 4294901760, %v7705_v11 }
 0x3cc   :  { %5563 = vmatprep.subr.mxu0 %v7595_v47  ;;  %5597 = vmatprep.subr.mxu1 %v3356_v24  ;;  %v7717_v25 = vsub.f32 %v4021_v34, %v7707_v12 }
 0x3cd   :  { %5564 = vmatpush3.msra.mxu0 %v7595_v47  ;;  %5598 = vmatpush3.msra.mxu1 %v3356_v24  ;;  %8200 = vst [vmem:[#allocation3_spill] sm:$0xff] %v7702_v17  ;;  %v3398_v24 = vand.u32 4294901760, %v3397_v37  ;;  %8202 = vst [vmem:[#allocation5_spill] sm:$0xff] %v7714_v21 }
 0x3ce   :  { %5565 = vmatprep.subr.mxu0 %v7605_v39  ;;  %5599 = vmatprep.subr.mxu1 %v3363_v6  ;;  %8203 = vst [vmem:[#allocation6_spill] sm:$0xff] %v7717_v25  ;;  %v7724_v33 = vand.u32 4294901760, %v7717_v25 }
 0x3cf   :  { %5566 = vmatpush3.msra.mxu0 %v7605_v39  ;;  %5600 = vmatpush3.msra.mxu1 %v3363_v6  ;;  %v3411_v6 = vsub.f32 %v7688_v8, %v7702_v17 }
 0x3d0   :  { %5567 = vmatprep.subr.mxu0 %v7618_v43  ;;  %5601 = vmatprep.subr.mxu1 %v3370_v63  ;;  %8204 = vst [vmem:[#allocation7_spill] sm:$0xff] %v7724_v33 }
 0x3d1   :  { %5568 = vmatpush3.msra.mxu0 %v7618_v43  ;;  %5602 = vmatpush3.msra.mxu1 %v3370_v63  ;;  %v3412_v57 = vand.u32 4294901760, %v3411_v6  ;;  %v3418_v63 = vsub.f32 %v7705_v11, %v7714_v21 }
 0x3d2   :  { %5569 = vmatprep.subr.mxu0 %v7633_v14  ;;  %5603 = vmatprep.subr.mxu1 %v3377_v44 }
 0x3d3   :  { %5570 = vmatpush3.msra.mxu0 %v7633_v14  ;;  %5604 = vmatpush3.msra.mxu1 %v3377_v44  ;;  %v3419_v48 = vand.u32 4294901760, %v3418_v63  ;;  %v3425_v44 = vsub.f32 %v7717_v25, %v7724_v33 }
 0x3d4   :  { %5571 = vmatprep.subr.mxu0 %v7649_v50  ;;  %5605 = vmatprep.subr.mxu1 %v3384_v31 }
 0x3d5   :  { %5572 = vmatpush3.msra.mxu0 %v7649_v50  ;;  %5606 = vmatpush3.msra.mxu1 %v3384_v31  ;;  %v3426_v20 = vand.u32 4294901760, %v3425_v44 }
 0x3d6   :  { %5573 = vmatprep.subr.mxu0 %v7660_v52  ;;  %5607 = vmatprep.subr.mxu1 %v3391_v16 }
 0x3d7   :  { %5574 = vmatpush3.msra.mxu0 %v7660_v52  ;;  %5608 = vmatpush3.msra.mxu1 %v3391_v16 }
 0x3d8   :  { %5575 = vmatprep.subr.mxu0 %v7674_v19  ;;  %5609 = vmatprep.subr.mxu1 %v3398_v24 }
 0x3d9   :  { %5576 = vmatpush3.msra.mxu0 %v7674_v19  ;;  %5610 = vmatpush3.msra.mxu1 %v3398_v24 }
 0x3da   :  { %5577 = vmatprep.subr.mxu0 %v7690_v56  ;;  %5611 = vmatprep.subr.mxu1 %v3405_v41 }
 0x3db   :  { %5578 = vmatpush3.msra.mxu0 %v7690_v56  ;;  %5612 = vmatpush3.msra.mxu1 %v3405_v41 }
 0x3dc   :  { %5579 = vmatprep.subr.mxu0 %v7707_v12  ;;  %5613 = vmatprep.subr.mxu1 %v3412_v57 }
 0x3dd   :  { %5580 = vmatpush3.msra.mxu0 %v7707_v12  ;;  %5614 = vmatpush3.msra.mxu1 %v3412_v57 }
 0x3de   :  { %5625 = vmatprep.subr.mxu0 %v7498_v54  ;;  %5615 = vmatprep.subr.mxu1 %v3419_v48 }
 0x3df   :  { %5616 = vmatpush3.msra.mxu1 %v3419_v48 }
 0x3e0   :  { %5617 = vmatprep.subr.mxu1 %v3426_v20 }
 0x3e1   :  { %5618 = vmatpush3.msra.mxu1 %v3426_v20 }
 0x3e2   :  { %5663 = vmatprep.subr.mxu1 %v7492_v61 }
 0x431   :  { %v5393_v51 = vpop.f32.mrf.mxu1 }
 0x433   :  { %v2672_v31 = vpop.f32.mrf.mxu1 }
 0x435   :  { %v5396_v1 = vpop.f32.mrf.mxu1 }
 0x437   :  { %v2684_v37 = vpop.f32.mrf.mxu1 }
 0x439   :  { %v5355_v28 = vpop.f32.mrf.mxu0 }
 0x43a   :  { %v2679_v44 = vadd.f32 %v5393_v51, %v5355_v28 }
 0x43b   :  { %v2491_v16 = vpop.f32.mrf.mxu0 }
 0x43c   :  { %v2673_v21 = vadd.f32 %v2672_v31, %v2491_v16 }
 0x43e   :  { %v5358_v34 = vpop.f32.mrf.mxu0 }
 0x43f   :  { %v2691_v30 = vadd.f32 %v5396_v1, %v5358_v34 }
 0x440   :  { %v2511_v24 = vpop.f32.mrf.mxu0 }
 0x441   :  { %v2685_v35 = vadd.f32 %v2684_v37, %v2511_v24 }
 0x453   :  { %v5469_v13 = vpop.f32.mrf.mxu1 }
 0x455   :  { %v2904_v41 = vpop.f32.mrf.mxu1 }
 0x458   :  { %v5472_v63 = vpop.f32.mrf.mxu1 }
 0x45a   :  { %v2920_v33 = vpop.f32.mrf.mxu1 }
 0x45c   :  { %v5431_v6 = vpop.f32.mrf.mxu0 }
 0x45d   :  { %v2802_v20 = vadd.f32 %v5431_v6, %v2679_v44 }
 0x45e   :  { %v2794_v57 = vpop.f32.mrf.mxu0 }
 0x45f   :  { %v2795_v49 = vadd.f32 %v2794_v57, %v2673_v21  ;;  %v2913_v0 = vadd.f32 %v5469_v13, %v2802_v20 }
 0x461   :  { %v5434_v48 = vpop.f32.mrf.mxu0  ;;  %v2905_v26 = vadd.f32 %v2904_v41, %v2795_v49 }
 0x462   :  { %v2816_v3 = vadd.f32 %v5434_v48, %v2691_v30 }
 0x463   :  { %v2808_v7 = vpop.f32.mrf.mxu0 }
 0x464   :  { %v2809_v58 = vadd.f32 %v2808_v7, %v2685_v35  ;;  %v2929_v51 = vadd.f32 %v5472_v63, %v2816_v3 }
 0x466   :  { %v2921_v1 = vadd.f32 %v2920_v33, %v2809_v58 }
 0x477   :  { %v5545_v17 = vpop.f32.mrf.mxu1 }
 0x479   :  { %v3152_v42 = vpop.f32.mrf.mxu1 }
 0x47b   :  { %v5548_v28 = vpop.f32.mrf.mxu1 }
 0x47d   :  { %v3164_v24 = vpop.f32.mrf.mxu1 }
 0x47e   :  { %v5507_v22 = vpop.f32.mrf.mxu0 }
 0x47f   :  { %v3054_v10 = vadd.f32 %v5507_v22, %v2913_v0 }
 0x480   :  { %v3047_v5 = vpop.f32.mrf.mxu0 }
 0x481   :  { %v3159_v40 = vadd.f32 %v5545_v17, %v3054_v10  ;;  %v3048_v25 = vadd.f32 %v3047_v5, %v2905_v26 }
 0x482   :  { %v5510_v11 = vpop.f32.mrf.mxu0 }
 0x483   :  { %v3175_v31 = vmax.f32 %v3159_v40, 0.0  ;;  %v3153_v16 = vadd.f32 %v3152_v42, %v3048_v25  ;;  %v3066_v6 = vadd.f32 %v5510_v11, %v2929_v51 }
 0x484   :  { %v3059_v21 = vpop.f32.mrf.mxu0 }
 0x485   :  { %v7731_v34 = vand.u32 4294901760, %v3175_v31  ;;  %v3174_v30 = vmax.f32 %v3153_v16, 0.0  ;;  %v3171_v37 = vadd.f32 %v5548_v28, %v3066_v6  ;;  %v3060_v13 = vadd.f32 %v3059_v21, %v2921_v1 }
 0x487   :  { %v7734_v22 = vsub.f32 %v3175_v31, %v7731_v34  ;;  %v7736_v0 = vand.u32 4294901760, %v3174_v30  ;;  %v3177_v5 = vmax.f32 %v3171_v37, 0.0  ;;  %v3165_v26 = vadd.f32 %v3164_v24, %v3060_v13 }
 0x489   :  { %v3288_v10 = vand.u32 4294901760, %v7734_v22  ;;  %v3277_v40 = vsub.f32 %v3174_v30, %v7736_v0  ;;  %v7740_v42 = vand.u32 4294901760, %v3177_v5  ;;  %v3176_v58 = vmax.f32 %v3165_v26, 0.0  ;;  %5619 = vmatprep.mubr.f32.mxu1 %v7736_v0 }
 0x48a   :  { %5620 = vmatmul.mubr.f32.vlgmr.msra.gmra.mxu1 %v7731_v34 }
 0x48b   :  { %v7745_v3 = vsub.f32 %v3177_v5, %v7740_v42  ;;  %v7747_v35 = vand.u32 4294901760, %v3176_v58  ;;  %5664 = vmatpush3.msra.mxu1 %v7492_v61  ;;  %v3278_v7 = vand.u32 4294901760, %v3277_v40  ;;  %v3289_v49 = vsub.f32 %v7734_v22, %v3288_v10 }
 0x48c   :  { %5665 = vmatprep.subr.mxu1 %v7500_v9 }
 0x48d   :  { %v7755_v17 = vsub.f32 %v3176_v58, %v7747_v35  ;;  %5666 = vmatpush3.msra.mxu1 %v7500_v9  ;;  %5622 = vmatprep.mubr.f32.mxu1 %v7747_v35  ;;  %v3279_v11 = vsub.f32 %v3277_v40, %v3278_v7  ;;  %v3308_v25 = vand.u32 4294901760, %v7745_v3  ;;  %v3290_v63 = vand.u32 4294901760, %v3289_v49 }
 0x48e   :  { %5667 = vmatprep.subr.mxu1 %v7513_v29  ;;  %5623 = vmatmul.mubr.f32.gmra.mxu1 %v7740_v42 }
 0x48f   :  { %5668 = vmatpush3.msra.mxu1 %v7513_v29  ;;  %5695 = vmatprep.mubr.f32.mxu1 %v3278_v7  ;;  %v3280_v33 = vand.u32 4294901760, %v3279_v11  ;;  %v3298_v41 = vand.u32 4294901760, %v7755_v17  ;;  %v3309_v44 = vsub.f32 %v7745_v3, %v3308_v25 }
 0x490   :  { %5669 = vmatprep.subr.mxu1 %v7525_v36 }
 0x491   :  { %5670 = vmatpush3.msra.mxu1 %v7525_v36  ;;  %5581 = vmatprep.mubr.f32.mxu0 %v3280_v33  ;;  %v3299_v57 = vsub.f32 %v7755_v17, %v3298_v41  ;;  %v3310_v20 = vand.u32 4294901760, %v3309_v44 }
 0x492   :  { %5671 = vmatprep.subr.mxu1 %v7527_v2  ;;  %5582 = vmatmul.mubr.f32.vlgmr.msra.gmra.mxu0 %v3290_v63 }
 0x493   :  { %5626 = vmatpush3.msra.mxu0 %v7498_v54  ;;  %5672 = vmatpush3.msra.mxu1 %v7527_v2  ;;  %v3300_v48 = vand.u32 4294901760, %v3299_v57  ;;  %v8205_v54 = vld [vmem:[#allocation4_spill] sm:$0xff] }
 0x494   :  { %5627 = vmatprep.subr.mxu0 %v7511_v4  ;;  %5673 = vmatprep.subr.mxu1 %v7529_v15 }
 0x495   :  { %5628 = vmatpush3.msra.mxu0 %v7511_v4  ;;  %5674 = vmatpush3.msra.mxu1 %v7529_v15  ;;  %v8208_v4 = vld [vmem:[#allocation17_spill] sm:$0xff] }
 0x496   :  { %5584 = vmatprep.mubr.f32.mxu0 %v3300_v48  ;;  %5629 = vmatprep.subr.mxu0 %v7541_v27 }
 0x497   :  { %5675 = vmatprep.subr.mxu1 %v7544_v55  ;;  %5585 = vmatmul.mubr.f32.gmra.mxu0 %v3310_v20 }
 0x498   :  { %5630 = vmatpush3.msra.mxu0 %v7541_v27  ;;  %5676 = vmatpush3.msra.mxu1 %v7544_v55  ;;  %v8213_v27 = vld [vmem:[#allocation12_spill] sm:$0xff] }
 0x499   :  { %5631 = vmatprep.subr.mxu0 %v7547_v38  ;;  %5657 = vmatprep.mubr.f32.mxu0 %v3277_v40 }
 0x49a   :  { %5677 = vmatprep.subr.mxu1 %v7595_v47  ;;  %5632 = vmatpush3.msra.mxu0 %v7547_v38  ;;  %v8215_v38 = vld [vmem:[#allocation14_spill] sm:$0xff] }
 0x49b   :  { %5678 = vmatpush3.msra.mxu1 %v7595_v47  ;;  %5633 = vmatprep.subr.mxu0 %v7550_v18 }
 0x49c   :  { %5679 = vmatprep.subr.mxu1 %v7605_v39  ;;  %5634 = vmatpush3.msra.mxu0 %v7550_v18  ;;  %v8216_v18 = vld [vmem:[#allocation15_spill] sm:$0xff] }
 0x49d   :  { %5680 = vmatpush3.msra.mxu1 %v7605_v39  ;;  %5635 = vmatprep.subr.mxu0 %v7553_v62 }
 0x49e   :  { %5681 = vmatprep.subr.mxu1 %v7618_v43  ;;  %5636 = vmatpush3.msra.mxu0 %v7553_v62  ;;  %v8217_v62 = vld [vmem:[#allocation18_spill] sm:$0xff] }
 0x49f   :  { %5682 = vmatpush3.msra.mxu1 %v7618_v43  ;;  %5637 = vmatprep.subr.mxu0 %v7562_v59 }
 0x4a0   :  { %5683 = vmatprep.subr.mxu1 %v7633_v14  ;;  %5638 = vmatpush3.msra.mxu0 %v7562_v59  ;;  %v8218_v59 = vld [vmem:[#allocation20_spill] sm:$0xff] }
 0x4a1   :  { %5684 = vmatpush3.msra.mxu1 %v7633_v14  ;;  %5639 = vmatprep.subr.mxu0 %v7603_v23 }
 0x4a2   :  { %5685 = vmatprep.subr.mxu1 %v7649_v50  ;;  %5640 = vmatpush3.msra.mxu0 %v7603_v23  ;;  %v8220_v23 = vld [vmem:[#allocation3_spill] sm:$0xff] }
 0x4a3   :  { %5686 = vmatpush3.msra.mxu1 %v7649_v50  ;;  %5641 = vmatprep.subr.mxu0 %v7616_v45 }
 0x4a4   :  { %5687 = vmatprep.subr.mxu1 %v7660_v52  ;;  %5642 = vmatpush3.msra.mxu0 %v7616_v45  ;;  %v8222_v45 = vld [vmem:[#allocation7_spill] sm:$0xff] }
 0x4a5   :  { %5688 = vmatpush3.msra.mxu1 %v7660_v52  ;;  %5643 = vmatprep.subr.mxu0 %v7631_v60 }
 0x4a6   :  { %5689 = vmatprep.subr.mxu1 %v7674_v19  ;;  %5644 = vmatpush3.msra.mxu0 %v7631_v60 }
 0x4a7   :  { %5690 = vmatpush3.msra.mxu1 %v7674_v19  ;;  %5645 = vmatprep.subr.mxu0 %v7646_v32 }
 0x4a8   :  { %5691 = vmatprep.subr.mxu1 %v7690_v56  ;;  %5646 = vmatpush3.msra.mxu0 %v7646_v32 }
 0x4a9   :  { %5692 = vmatpush3.msra.mxu1 %v7690_v56  ;;  %5647 = vmatprep.subr.mxu0 %v7663_v53 }
 0x4aa   :  { %5693 = vmatprep.subr.mxu1 %v7707_v12  ;;  %5648 = vmatpush3.msra.mxu0 %v7663_v53 }
 0x4ab   :  { %5694 = vmatpush3.msra.mxu1 %v7707_v12  ;;  %5649 = vmatprep.subr.mxu0 %v7672_v46 }
 0x4ac   :  { %5696 = vmatmul.mubr.f32.vlgmr.msra.gmra.mxu1 %v3288_v10  ;;  %5739 = vmatprep.subr.mxu1 %v7492_v61 }
 0x4ad   :  { %5650 = vmatpush3.msra.mxu0 %v7672_v46  ;;  %5698 = vmatprep.mubr.f32.mxu1 %v3298_v41 }
 0x4ae   :  { %5740 = vmatpush3.msra.mxu1 %v7492_v61  ;;  %5651 = vmatprep.subr.mxu0 %v7688_v8  ;;  %v8206_v61 = vld [vmem:[#allocation6_spill] sm:$0xff] }
 0x4af   :  { %5741 = vmatprep.subr.mxu1 %v7500_v9  ;;  %5652 = vmatpush3.msra.mxu0 %v7688_v8 }
 0x4b0   :  { %5742 = vmatpush3.msra.mxu1 %v7500_v9  ;;  %5653 = vmatprep.subr.mxu0 %v8205_v54  ;;  %v8207_v9 = vld [vmem:[#allocation13_spill] sm:$0xff] }
 0x4b1   :  { %5699 = vmatmul.mubr.f32.gmra.mxu1 %v3308_v25  ;;  %5743 = vmatprep.subr.mxu1 %v7513_v29 }
 0x4b2   :  { %5654 = vmatpush3.msra.mxu0 %v8205_v54  ;;  %5744 = vmatpush3.msra.mxu1 %v7513_v29  ;;  %v8209_v29 = vld [vmem:[#allocation8_spill] sm:$0xff] }
 0x4b3   :  { %5771 = vmatprep.mubr.f32.mxu1 %v7736_v0  ;;  %5655 = vmatprep.subr.mxu0 %v8206_v61 }
 0x4b4   :  { %5745 = vmatprep.subr.mxu1 %v7525_v36  ;;  %5656 = vmatpush3.msra.mxu0 %v8206_v61 }
 0x4b5   :  { %5746 = vmatpush3.msra.mxu1 %v7525_v36  ;;  %5658 = vmatmul.mubr.f32.vlgmr.msra.gmra.mxu0 %v7734_v22  ;;  %v8210_v36 = vld [vmem:[#allocation10_spill] sm:$0xff] }
 0x4b6   :  { %5701 = vmatprep.subr.mxu0 %v8207_v9  ;;  %5747 = vmatprep.subr.mxu1 %v7527_v2 }
 0x4b7   :  { %5660 = vmatprep.mubr.f32.mxu0 %v7755_v17  ;;  %5702 = vmatpush3.msra.mxu0 %v8207_v9 }
 0x4b8   :  { %5748 = vmatpush3.msra.mxu1 %v7527_v2  ;;  %5703 = vmatprep.subr.mxu0 %v8208_v4  ;;  %v8211_v2 = vld [vmem:[#allocation19_spill] sm:$0xff] }
 0x4b9   :  { %5749 = vmatprep.subr.mxu1 %v7529_v15  ;;  %5704 = vmatpush3.msra.mxu0 %v8208_v4 }
 0x4ba   :  { %5750 = vmatpush3.msra.mxu1 %v7529_v15  ;;  %5661 = vmatmul.mubr.f32.gmra.mxu0 %v7745_v3  ;;  %v8212_v15 = vld [vmem:[#allocation21_spill] sm:$0xff] }
 0x4bb   :  { %5705 = vmatprep.subr.mxu0 %v8209_v29  ;;  %5751 = vmatprep.subr.mxu1 %v7544_v55 }
 0x4bc   :  { %5706 = vmatpush3.msra.mxu0 %v8209_v29  ;;  %5733 = vmatprep.mubr.f32.mxu0 %v7736_v0 }
 0x4bd   :  { %5752 = vmatpush3.msra.mxu1 %v7544_v55  ;;  %5707 = vmatprep.subr.mxu0 %v8210_v36  ;;  %v8214_v55 = vld [vmem:[#allocation16_spill] sm:$0xff] }
 0x4be   :  { %5753 = vmatprep.subr.mxu1 %v7595_v47  ;;  %5708 = vmatpush3.msra.mxu0 %v8210_v36 }
 0x4bf   :  { %5754 = vmatpush3.msra.mxu1 %v7595_v47  ;;  %5709 = vmatprep.subr.mxu0 %v8211_v2  ;;  %v8219_v47 = vld [vmem:[#allocation2_spill] sm:$0xff] }
 0x4c0   :  { %5755 = vmatprep.subr.mxu1 %v7605_v39  ;;  %5710 = vmatpush3.msra.mxu0 %v8211_v2 }
 0x4c1   :  { %5756 = vmatpush3.msra.mxu1 %v7605_v39  ;;  %5711 = vmatprep.subr.mxu0 %v8212_v15  ;;  %v8221_v39 = vld [vmem:[#allocation5_spill] sm:$0xff] }
 0x4c2   :  { %5757 = vmatprep.subr.mxu1 %v7618_v43  ;;  %5712 = vmatpush3.msra.mxu0 %v8212_v15 }
 0x4c3   :  { %5758 = vmatpush3.msra.mxu1 %v7618_v43  ;;  %5713 = vmatprep.subr.mxu0 %v8213_v27 }
 0x4c4   :  { %5759 = vmatprep.subr.mxu1 %v7633_v14  ;;  %5714 = vmatpush3.msra.mxu0 %v8213_v27 }
 0x4c5   :  { %5760 = vmatpush3.msra.mxu1 %v7633_v14  ;;  %5715 = vmatprep.subr.mxu0 %v8214_v55 }
 0x4c6   :  { %5761 = vmatprep.subr.mxu1 %v7649_v50  ;;  %5716 = vmatpush3.msra.mxu0 %v8214_v55 }
 0x4c7   :  { %5762 = vmatpush3.msra.mxu1 %v7649_v50  ;;  %5717 = vmatprep.subr.mxu0 %v8215_v38 }
 0x4c8   :  { %5763 = vmatprep.subr.mxu1 %v7660_v52  ;;  %5718 = vmatpush3.msra.mxu0 %v8215_v38 }
 0x4c9   :  { %5764 = vmatpush3.msra.mxu1 %v7660_v52  ;;  %5719 = vmatprep.subr.mxu0 %v8216_v18 }
 0x4ca   :  { %5765 = vmatprep.subr.mxu1 %v7674_v19  ;;  %5720 = vmatpush3.msra.mxu0 %v8216_v18 }
 0x4cb   :  { %5766 = vmatpush3.msra.mxu1 %v7674_v19  ;;  %5721 = vmatprep.subr.mxu0 %v8217_v62 }
 0x4cc   :  { %5767 = vmatprep.subr.mxu1 %v7690_v56  ;;  %5722 = vmatpush3.msra.mxu0 %v8217_v62 }
 0x4cd   :  { %5768 = vmatpush3.msra.mxu1 %v7690_v56  ;;  %5723 = vmatprep.subr.mxu0 %v8218_v59 }
 0x4ce   :  { %5769 = vmatprep.subr.mxu1 %v7707_v12  ;;  %5724 = vmatpush3.msra.mxu0 %v8218_v59 }
 0x4cf   :  { %5770 = vmatpush3.msra.mxu1 %v7707_v12  ;;  %5725 = vmatprep.subr.mxu0 %v8219_v47 }
 0x4d0   :  { %5772 = vmatmul.mubr.f32.vlgmr.msra.gmra.mxu1 %v7731_v34  ;;  %5726 = vmatpush3.msra.mxu0 %v8219_v47 }
 0x4d1   :  { %5774 = vmatprep.mubr.f32.mxu1 %v7747_v35  ;;  %5727 = vmatprep.subr.mxu0 %v8220_v23 }
 0x4d2   :  { %5728 = vmatpush3.msra.mxu0 %v8220_v23 }
 0x4d3   :  { %5729 = vmatprep.subr.mxu0 %v8221_v39 }
 0x4d4   :  { %5775 = vmatmul.mubr.f32.gmra.mxu1 %v7740_v42  ;;  %5730 = vmatpush3.msra.mxu0 %v8221_v39 }
 0x4d5   :  { %5731 = vmatprep.subr.mxu0 %v8222_v45 }
 0x4d6   :  { %5732 = vmatpush3.msra.mxu0 %v8222_v45 }
 0x4d7   :  { %5734 = vmatmul.mubr.f32.vlgmr.msra.gmra.mxu0 %v7731_v34 }
 0x4d8   :  { %5736 = vmatprep.mubr.f32.mxu0 %v7747_v35 }
 0x4db   :  { %5737 = vmatmul.mubr.f32.gmra.mxu0 %v7740_v42 }
 0x54a   :  { %v5621_v43 = vpop.f32.mrf.mxu1 }
 0x54c   :  { %v3463_v60 = vpop.f32.mrf.mxu1 }
 0x54e   :  { %v5624_v32 = vpop.f32.mrf.mxu1 }
 0x550   :  { %v3475_v52 = vpop.f32.mrf.mxu1 }
 0x552   :  { %v5583_v14 = vpop.f32.mrf.mxu0 }
 0x553   :  { %v3470_v28 = vadd.f32 %v5621_v43, %v5583_v14 }
 0x554   :  { %v3282_v50 = vpop.f32.mrf.mxu0 }
 0x555   :  { %v3464_v6 = vadd.f32 %v3463_v60, %v3282_v50 }
 0x557   :  { %v5586_v53 = vpop.f32.mrf.mxu0 }
 0x558   :  { %v3482_v34 = vadd.f32 %v5624_v32, %v5586_v53 }
 0x559   :  { %v3302_v19 = vpop.f32.mrf.mxu0 }
 0x55a   :  { %v3476_v13 = vadd.f32 %v3475_v52, %v3302_v19 }
 0x56c   :  { %v5697_v46 = vpop.f32.mrf.mxu1 }
 0x56e   :  { %v3695_v8 = vpop.f32.mrf.mxu1 }
 0x571   :  { %v5700_v12 = vpop.f32.mrf.mxu1 }
 0x573   :  { %v3711_v31 = vpop.f32.mrf.mxu1 }
 0x575   :  { %v5659_v56 = vpop.f32.mrf.mxu0 }
 0x576   :  { %v3593_v1 = vadd.f32 %v5659_v56, %v3470_v28 }
 0x577   :  { %v3585_v51 = vpop.f32.mrf.mxu0 }
 0x578   :  { %v3586_v30 = vadd.f32 %v3585_v51, %v3464_v6  ;;  %v3704_v22 = vadd.f32 %v5697_v46, %v3593_v1 }
 0x57a   :  { %v5662_v16 = vpop.f32.mrf.mxu0  ;;  %v3696_v40 = vadd.f32 %v3695_v8, %v3586_v30 }
 0x57b   :  { %v3607_v24 = vadd.f32 %v5662_v16, %v3482_v34 }
 0x57c   :  { %v3599_v37 = vpop.f32.mrf.mxu0 }
 0x57d   :  { %v3600_v26 = vadd.f32 %v3599_v37, %v3476_v13  ;;  %v3720_v35 = vadd.f32 %v5700_v12, %v3607_v24 }
 0x57f   :  { %v3712_v25 = vadd.f32 %v3711_v31, %v3600_v26 }
 0x590   :  { %v5773_v21 = vpop.f32.mrf.mxu1 }
 0x592   :  { %v3943_v0 = vpop.f32.mrf.mxu1 }
 0x594   :  { %v5776_v7 = vpop.f32.mrf.mxu1 }
 0x596   :  { %v3955_v57 = vpop.f32.mrf.mxu1 }
 0x597   :  { %v5735_v5 = vpop.f32.mrf.mxu0 }
 0x598   :  { %v3845_v10 = vadd.f32 %v5735_v5, %v3704_v22 }
 0x599   :  { %v3838_v42 = vpop.f32.mrf.mxu0 }
 0x59a   :  { %v3950_v58 = vadd.f32 %v5773_v21, %v3845_v10  ;;  %v3839_v3 = vadd.f32 %v3838_v42, %v3696_v40 }
 0x59b   :  { %v5738_v49 = vpop.f32.mrf.mxu0 }
 0x59c   :  { %3966 = vst [vmem:[%s7922_s2 + $0x8] sm:$0xff] %v3950_v58  ;;  %v3944_v17 = vadd.f32 %v3943_v0, %v3839_v3  ;;  %v3857_v11 = vadd.f32 %v5738_v49, %v3720_v35 }
 0x59d   :  { %v3850_v33 = vpop.f32.mrf.mxu0 }
 0x59e   :  { %3965 = vst [vmem:[%s7922_s2] sm:$0xff] %v3944_v17  ;;  %v3962_v41 = vadd.f32 %v5776_v7, %v3857_v11  ;;  %v3851_v63 = vadd.f32 %v3850_v33, %v3712_v25 }
 0x5a0   :  { %3968 = vst [vmem:[%s7922_s2 + $0x18] sm:$0xff] %v3962_v41  ;;  %v3956_v44 = vadd.f32 %v3955_v57, %v3851_v63 }
 0x5a2   :  { %3967 = vst [vmem:[%s7922_s2 + $0x10] sm:$0xff] %v3956_v44 }

</bundles_post_ra>
